<compile_context>
chip_gen: v6e
topology: v6e:2x2x1
jax: 0.10.0
libtpu: 0.0.40
codegen_flags: <defaults>
</compile_context>

<pallas_src>
import jax
import jax.numpy as jnp
from jax.experimental import pallas as pl
from jax.experimental.pallas import tpu as pltpu


def _conv_block_kernel(x_ref, w_ref, b_ref, se_ref, out_ref, rhs_ref):
    """One grid step = Nb batch elements.

    x_ref  : (Nb, Cin, L)       raw signal block (native NCW layout)
    w_ref  : (Cout, 4*Cpad)     BN-folded weights, taps stacked on the contraction dim
    b_ref  : (Cout, 1)          BN-folded bias / shift
    se_ref : (L, L//2)          one-hot even-position selector, se[2m, m] = 1
    out_ref: (Nb, Cout, L//2)   pooled output
    rhs_ref: (4*Cpad, Nb*L)     VMEM scratch holding the tap-stacked GEMM RHS
    """
    nb, cin, length = x_ref.shape
    cpad = rhs_ref.shape[0] // 4
    cout = out_ref.shape[1]

    # Keep the padded contraction rows exactly zero so the (zero) padded weight columns
    # never multiply stale VMEM contents.  Unconditional each step -> safe under
    # "parallel" megacore sharding of the grid axis.
    if cpad != cin:
        rhs_ref[...] = jnp.zeros_like(rhs_ref)

    # Stage the 4 taps of every batch element into the sublane-aligned RHS scratch.
    # padding='same' with k=4 (PyTorch: 1 left / 2 right) -> conv[l] uses
    # x[l-1], x[l], x[l+1], x[l+2] for taps 0..3.
    for b in range(nb):
        xb = x_ref[b]                                        # (Cin, L)
        z1 = jnp.zeros((cin, 1), xb.dtype)
        z2 = jnp.zeros((cin, 2), xb.dtype)
        base = b * length
        rhs_ref[0 * cpad:0 * cpad + cin, base:base + length] = jnp.concatenate(
            [z1, xb[:, :length - 1]], axis=1)                # x[l-1]
        rhs_ref[1 * cpad:1 * cpad + cin, base:base + length] = xb            # x[l]
        rhs_ref[2 * cpad:2 * cpad + cin, base:base + length] = jnp.concatenate(
            [xb[:, 1:], z1], axis=1)                         # x[l+1]
        rhs_ref[3 * cpad:3 * cpad + cin, base:base + length] = jnp.concatenate(
            [xb[:, 2:], z2], axis=1)                         # x[l+2]

    # One fused MXU GEMM: all 4 taps, all channels, all Nb*L positions (lane-dense RHS).
    y = jnp.dot(w_ref[...], rhs_ref[...],
                preferred_element_type=jnp.float32)          # (Cout, Nb*L)

    # MaxPool candidates: zmax[:, l] = max(conv[l], conv[l+1]).  The shifted column that
    # leaks across a batch boundary only lands on odd l, which the even-position
    # selection below discards.
    y_next = jnp.concatenate([y[:, 1:], jnp.zeros((cout, 1), y.dtype)], axis=1)
    zmax = jnp.maximum(y, y_next)

    # Stride-2 compaction (keep even positions) as a one-hot matmul on the idle MXU,
    # then the folded BN shift + LeakyReLU on the pooled (Cout, L/2) tile only
    # (the max-pool commutes with the monotone bias add and LeakyReLU).
    se = se_ref[...]                                         # (L, L//2)
    bias = b_ref[...]                                        # (Cout, 1)
    for b in range(nb):
        zb = zmax[:, b * length:(b + 1) * length]            # (Cout, L)
        pooled = jnp.dot(zb, se, preferred_element_type=jnp.float32)   # (Cout, L//2)
        v = pooled + bias
        out_ref[b] = jnp.maximum(v, 0.2 * v).astype(out_ref.dtype)     # LeakyReLU(0.2)


def convolution_block(x, weight, conv_bias, gamma, beta, running_mean, running_var,
                      *, eps=1e-5, sampling_factor=2, batch_block=8):
    """ConvolutionBlock forward: Conv1d(k=4,'same') + BN(eval) + LeakyReLU(0.2) + MaxPool1d(2).

    x:       (N, Cin, L)       float32  (PyTorch NCW layout, L even)
    weight:  (Cout, Cin, 4)    float32  (PyTorch Conv1d weight layout)
    conv_bias, gamma, beta, running_mean, running_var: (Cout,) float32
    returns: (N, Cout, L // 2) float32
    """
    N, Cin, L = x.shape
    Cout, Cin_w, K = weight.shape
    assert Cin_w == Cin and K == 4 and sampling_factor == 2 and L % 2 == 0
    M = L // 2
    cpad = ((Cin + 7) // 8) * 8          # sublane-aligned tap block height

    # ---- Fold eval-mode BatchNorm into the conv weights / bias (tiny host-side ops).
    scale = gamma / jnp.sqrt(running_var + eps)                         # (Cout,)
    w_eff = weight * scale[:, None, None]                               # (Cout, Cin, 4)
    b_eff = scale * (conv_bias - running_mean) + beta                   # (Cout,)

    # Taps stacked along the contraction dim, each tap block zero-padded to cpad rows so
    # the in-kernel scratch stores stay tile-aligned.
    w_pad = jnp.pad(jnp.transpose(w_eff, (0, 2, 1)),
                    ((0, 0), (0, 0), (0, cpad - Cin))).reshape(Cout, 4 * cpad)
    b2d = b_eff.reshape(Cout, 1)

    # One-hot even-position selector used for the stride-2 max-pool compaction.
    se = (jnp.arange(L)[:, None] == (2 * jnp.arange(M))[None, :]).astype(x.dtype)

    # ---- Batch blocking: Nb examples per grid step (wide DMAs + wide GEMM RHS).
    nb = int(max(1, min(batch_block, N)))
    n_pad = (-N) % nb
    xp = jnp.pad(x, ((0, n_pad), (0, 0), (0, 0))) if n_pad else x
    Np = N + n_pad

    flops = 2 * Cout * (4 * cpad) * (Np * L) + 2 * Cout * L * M * Np
    bytes_accessed = 4 * (Np * Cin * L + Np * Cout * M + Cout * 4 * cpad + Cout + L * M)

    out = pl.pallas_call(
        _conv_block_kernel,
        out_shape=jax.ShapeDtypeStruct((Np, Cout, M), x.dtype),
        grid=(Np // nb,),
        in_specs=[
            pl.BlockSpec((nb, Cin, L), lambda n: (n, 0, 0)),      # signal block
            pl.BlockSpec((Cout, 4 * cpad), lambda n: (0, 0)),     # folded weights (loaded once)
            pl.BlockSpec((Cout, 1), lambda n: (0, 0)),            # folded bias   (loaded once)
            pl.BlockSpec((L, M), lambda n: (0, 0)),               # pool selector (loaded once)
        ],
        out_specs=pl.BlockSpec((nb, Cout, M), lambda n: (n, 0, 0)),
        scratch_shapes=[pltpu.VMEM((4 * cpad, nb * L), jnp.float32)],
        compiler_params=pltpu.CompilerParams(dimension_semantics=("parallel",)),
        cost_estimate=pl.CostEstimate(flops=int(flops), transcendentals=0,
                                      bytes_accessed=int(bytes_accessed)),
    )(xp, w_pad, b2d, se)
    return out[:N] if n_pad else out


def ref_convolution_block(x, weight, conv_bias, gamma, beta, mean, var,
                          eps=1e-5, negative_slope=0.2, pool=2):
    """Pure-JAX reference: Conv1d(k=4,'same') + BN(eval) + LeakyReLU(0.2) + MaxPool1d(2)."""
    N, Cin, L = x.shape
    Cout, _, K = weight.shape
    left = (K - 1) // 2                      # PyTorch 'same': total = K-1, left = total//2
    right = (K - 1) - left
    xpad = jnp.pad(x, ((0, 0), (0, 0), (left, right)))
    conv = jnp.zeros((N, Cout, L), jnp.float32)
    for t in range(K):
        conv = conv + jnp.einsum('ncl,oc->nol', xpad[:, :, t:t + L], weight[:, :, t],
                                 precision='highest')
    conv = conv + conv_bias[None, :, None]
    bn = (conv - mean[None, :, None]) / jnp.sqrt(var[None, :, None] + eps)
    bn = bn * gamma[None, :, None] + beta[None, :, None]
    act = jnp.where(bn >= 0, bn, negative_slope * bn)
    M = L // pool
    return jnp.max(act[:, :, :M * pool].reshape(N, Cout, M, pool), axis=-1)


if __name__ == "__main__":
    key = jax.random.PRNGKey(0)
    N, Cin, Cout, L, K = 16, 4, 8, 256, 4

    ks = jax.random.split(key, 7)
    x = jax.random.normal(ks[0], (N, Cin, L), dtype=jnp.float32)
    # Deterministic synthetic parameters (PyTorch-style uniform init bounds).
    bound = 1.0 / (Cin * K) ** 0.5
    weight = jax.random.uniform(ks[1], (Cout, Cin, K), jnp.float32, -bound, bound)
    conv_bias = jax.random.uniform(ks[2], (Cout,), jnp.float32, -bound, bound)
    gamma = jax.random.uniform(ks[3], (Cout,), jnp.float32, 0.5, 1.5)
    beta = jax.random.uniform(ks[4], (Cout,), jnp.float32, -0.5, 0.5)
    running_mean = 0.1 * jax.random.normal(ks[5], (Cout,), dtype=jnp.float32)
    running_var = jax.random.uniform(ks[6], (Cout,), jnp.float32, 0.5, 2.0)

    out = convolution_block(x, weight, conv_bias, gamma, beta,
                            running_mean, running_var, batch_block=8)
    out = jax.block_until_ready(out)

    ref = ref_convolution_block(x, weight, conv_bias, gamma, beta,
                                running_mean, running_var)
    assert out.shape == (N, Cout, L // 2), out.shape
    max_err = float(jnp.max(jnp.abs(out - ref)))
    assert jnp.allclose(out, ref, atol=1e-3, rtol=1e-3), max_err

    print("KERNEL_OK")
</pallas_src>

<mosaic_0001>
module attributes {stable_mosaic.version = 11 : i64} {
  func.func @_conv_block_kernel(%arg0: i32, %arg1: memref<8x4x256xf32, #tpu.memory_space<vmem>>, %arg2: memref<8x32xf32, #tpu.memory_space<vmem>>, %arg3: memref<8x1xf32, #tpu.memory_space<vmem>>, %arg4: memref<256x128xf32, #tpu.memory_space<vmem>>, %arg5: memref<8x8x128xf32, #tpu.memory_space<vmem>>, %arg6: memref<32x2048xf32, #tpu.memory_space<vmem>>) attributes {dimension_semantics = [#tpu.dimension_semantics<parallel>], iteration_bounds = array<i64: 2>, scalar_prefetch = 0 : i64, scratch_operands = 1 : i64, tpu.core_type = #tpu.core_type<tc>, window_params = [{transform_indices = @transform_0, window_bounds = array<i64: 8, 4, 256>}, {pipeline_mode = #tpu.pipeline_mode<synchronous>, transform_indices = @transform_1, window_bounds = array<i64: 8, 32>}, {pipeline_mode = #tpu.pipeline_mode<synchronous>, transform_indices = @transform_2, window_bounds = array<i64: 8, 1>}, {pipeline_mode = #tpu.pipeline_mode<synchronous>, transform_indices = @transform_3, window_bounds = array<i64: 256, 128>}, {transform_indices = @transform_4, window_bounds = array<i64: 8, 8, 128>}]} {
    %cst = arith.constant 0.000000e+00 : f32
    %0 = vector.broadcast %cst : f32 to vector<32x2048xf32>
    %c0 = arith.constant 0 : index
    %c0_0 = arith.constant 0 : index
    %1 = vector.load %arg6[%c0, %c0_0] : memref<32x2048xf32, #tpu.memory_space<vmem>>, vector<32x2048xf32>
    tpu.vector_store %arg6[%c0, %c0_0], %0 {strides = array<i32>} : memref<32x2048xf32, #tpu.memory_space<vmem>>, vector<32x2048xf32>,
    %c0_1 = arith.constant 0 : index
    %c0_2 = arith.constant 0 : index
    %c0_3 = arith.constant 0 : index
    %2 = vector.load %arg1[%c0_1, %c0_2, %c0_3] : memref<8x4x256xf32, #tpu.memory_space<vmem>>, vector<1x4x256xf32>
    %3 = vector.shape_cast %2 : vector<1x4x256xf32> to vector<4x256xf32>
    %cst_4 = arith.constant 0.000000e+00 : f32
    %4 = vector.broadcast %cst_4 : f32 to vector<4x1xf32>
    %cst_5 = arith.constant 0.000000e+00 : f32
    %5 = vector.broadcast %cst_5 : f32 to vector<4x2xf32>
    %6 = vector.extract_strided_slice %3 {offsets = [0, 0], sizes = [4, 255], strides = [1, 1]} : vector<4x256xf32> to vector<4x255xf32>
    %7 = tpu.concatenate %4, %6 in 1 : vector<4x1xf32>, vector<4x255xf32> -> vector<4x256xf32>
    %c0_6 = arith.constant 0 : index
    %c0_7 = arith.constant 0 : index
    %8 = vector.load %arg6[%c0_6, %c0_7] : memref<32x2048xf32, #tpu.memory_space<vmem>>, vector<4x256xf32>
    tpu.vector_store %arg6[%c0_6, %c0_7], %7 {strides = array<i32>} : memref<32x2048xf32, #tpu.memory_space<vmem>>, vector<4x256xf32>,
    %c8 = arith.constant 8 : index
    %c0_8 = arith.constant 0 : index
    %9 = vector.load %arg6[%c8, %c0_8] : memref<32x2048xf32, #tpu.memory_space<vmem>>, vector<4x256xf32>
    tpu.vector_store %arg6[%c8, %c0_8], %3 {strides = array<i32>} : memref<32x2048xf32, #tpu.memory_space<vmem>>, vector<4x256xf32>,
    %10 = vector.extract_strided_slice %3 {offsets = [0, 1], sizes = [4, 255], strides = [1, 1]} : vector<4x256xf32> to vector<4x255xf32>
    %11 = tpu.concatenate %10, %4 in 1 : vector<4x255xf32>, vector<4x1xf32> -> vector<4x256xf32>
    %c16 = arith.constant 16 : index
    %c0_9 = arith.constant 0 : index
    %12 = vector.load %arg6[%c16, %c0_9] : memref<32x2048xf32, #tpu.memory_space<vmem>>, vector<4x256xf32>
    tpu.vector_store %arg6[%c16, %c0_9], %11 {strides = array<i32>} : memref<32x2048xf32, #tpu.memory_space<vmem>>, vector<4x256xf32>,
    %13 = vector.extract_strided_slice %3 {offsets = [0, 2], sizes = [4, 254], strides = [1, 1]} : vector<4x256xf32> to vector<4x254xf32>
    %14 = tpu.concatenate %13, %5 in 1 : vector<4x254xf32>, vector<4x2xf32> -> vector<4x256xf32>
    %c24 = arith.constant 24 : index
    %c0_10 = arith.constant 0 : index
    %15 = vector.load %arg6[%c24, %c0_10] : memref<32x2048xf32, #tpu.memory_space<vmem>>, vector<4x256xf32>
    tpu.vector_store %arg6[%c24, %c0_10], %14 {strides = array<i32>} : memref<32x2048xf32, #tpu.memory_space<vmem>>, vector<4x256xf32>,
    %c1 = arith.constant 1 : index
    %c0_11 = arith.constant 0 : index
    %c0_12 = arith.constant 0 : index
    %16 = vector.load %arg1[%c1, %c0_11, %c0_12] : memref<8x4x256xf32, #tpu.memory_space<vmem>>, vector<1x4x256xf32>
    %17 = vector.shape_cast %16 : vector<1x4x256xf32> to vector<4x256xf32>
    %cst_13 = arith.constant 0.000000e+00 : f32
    %18 = vector.broadcast %cst_13 : f32 to vector<4x1xf32>
    %cst_14 = arith.constant 0.000000e+00 : f32
    %19 = vector.broadcast %cst_14 : f32 to vector<4x2xf32>
    %20 = vector.extract_strided_slice %17 {offsets = [0, 0], sizes = [4, 255], strides = [1, 1]} : vector<4x256xf32> to vector<4x255xf32>
    %21 = tpu.concatenate %18, %20 in 1 : vector<4x1xf32>, vector<4x255xf32> -> vector<4x256xf32>
    %c0_15 = arith.constant 0 : index
    %c256 = arith.constant 256 : index
    %22 = vector.load %arg6[%c0_15, %c256] : memref<32x2048xf32, #tpu.memory_space<vmem>>, vector<4x256xf32>
    tpu.vector_store %arg6[%c0_15, %c256], %21 {strides = array<i32>} : memref<32x2048xf32, #tpu.memory_space<vmem>>, vector<4x256xf32>,
    %c8_16 = arith.constant 8 : index
    %c256_17 = arith.constant 256 : index
    %23 = vector.load %arg6[%c8_16, %c256_17] : memref<32x2048xf32, #tpu.memory_space<vmem>>, vector<4x256xf32>
    tpu.vector_store %arg6[%c8_16, %c256_17], %17 {strides = array<i32>} : memref<32x2048xf32, #tpu.memory_space<vmem>>, vector<4x256xf32>,
    %24 = vector.extract_strided_slice %17 {offsets = [0, 1], sizes = [4, 255], strides = [1, 1]} : vector<4x256xf32> to vector<4x255xf32>
    %25 = tpu.concatenate %24, %18 in 1 : vector<4x255xf32>, vector<4x1xf32> -> vector<4x256xf32>
    %c16_18 = arith.constant 16 : index
    %c256_19 = arith.constant 256 : index
    %26 = vector.load %arg6[%c16_18, %c256_19] : memref<32x2048xf32, #tpu.memory_space<vmem>>, vector<4x256xf32>
    tpu.vector_store %arg6[%c16_18, %c256_19], %25 {strides = array<i32>} : memref<32x2048xf32, #tpu.memory_space<vmem>>, vector<4x256xf32>,
    %27 = vector.extract_strided_slice %17 {offsets = [0, 2], sizes = [4, 254], strides = [1, 1]} : vector<4x256xf32> to vector<4x254xf32>
    %28 = tpu.concatenate %27, %19 in 1 : vector<4x254xf32>, vector<4x2xf32> -> vector<4x256xf32>
    %c24_20 = arith.constant 24 : index
    %c256_21 = arith.constant 256 : index
    %29 = vector.load %arg6[%c24_20, %c256_21] : memref<32x2048xf32, #tpu.memory_space<vmem>>, vector<4x256xf32>
    tpu.vector_store %arg6[%c24_20, %c256_21], %28 {strides = array<i32>} : memref<32x2048xf32, #tpu.memory_space<vmem>>, vector<4x256xf32>,
    %c2 = arith.constant 2 : index
    %c0_22 = arith.constant 0 : index
    %c0_23 = arith.constant 0 : index
    %30 = vector.load %arg1[%c2, %c0_22, %c0_23] : memref<8x4x256xf32, #tpu.memory_space<vmem>>, vector<1x4x256xf32>
    %31 = vector.shape_cast %30 : vector<1x4x256xf32> to vector<4x256xf32>
    %cst_24 = arith.constant 0.000000e+00 : f32
    %32 = vector.broadcast %cst_24 : f32 to vector<4x1xf32>
    %cst_25 = arith.constant 0.000000e+00 : f32
    %33 = vector.broadcast %cst_25 : f32 to vector<4x2xf32>
    %34 = vector.extract_strided_slice %31 {offsets = [0, 0], sizes = [4, 255], strides = [1, 1]} : vector<4x256xf32> to vector<4x255xf32>
    %35 = tpu.concatenate %32, %34 in 1 : vector<4x1xf32>, vector<4x255xf32> -> vector<4x256xf32>
    %c0_26 = arith.constant 0 : index
    %c512 = arith.constant 512 : index
    %36 = vector.load %arg6[%c0_26, %c512] : memref<32x2048xf32, #tpu.memory_space<vmem>>, vector<4x256xf32>
    tpu.vector_store %arg6[%c0_26, %c512], %35 {strides = array<i32>} : memref<32x2048xf32, #tpu.memory_space<vmem>>, vector<4x256xf32>,
    %c8_27 = arith.constant 8 : index
    %c512_28 = arith.constant 512 : index
    %37 = vector.load %arg6[%c8_27, %c512_28] : memref<32x2048xf32, #tpu.memory_space<vmem>>, vector<4x256xf32>
    tpu.vector_store %arg6[%c8_27, %c512_28], %31 {strides = array<i32>} : memref<32x2048xf32, #tpu.memory_space<vmem>>, vector<4x256xf32>,
    %38 = vector.extract_strided_slice %31 {offsets = [0, 1], sizes = [4, 255], strides = [1, 1]} : vector<4x256xf32> to vector<4x255xf32>
    %39 = tpu.concatenate %38, %32 in 1 : vector<4x255xf32>, vector<4x1xf32> -> vector<4x256xf32>
    %c16_29 = arith.constant 16 : index
    %c512_30 = arith.constant 512 : index
    %40 = vector.load %arg6[%c16_29, %c512_30] : memref<32x2048xf32, #tpu.memory_space<vmem>>, vector<4x256xf32>
    tpu.vector_store %arg6[%c16_29, %c512_30], %39 {strides = array<i32>} : memref<32x2048xf32, #tpu.memory_space<vmem>>, vector<4x256xf32>,
    %41 = vector.extract_strided_slice %31 {offsets = [0, 2], sizes = [4, 254], strides = [1, 1]} : vector<4x256xf32> to vector<4x254xf32>
    %42 = tpu.concatenate %41, %33 in 1 : vector<4x254xf32>, vector<4x2xf32> -> vector<4x256xf32>
    %c24_31 = arith.constant 24 : index
    %c512_32 = arith.constant 512 : index
    %43 = vector.load %arg6[%c24_31, %c512_32] : memref<32x2048xf32, #tpu.memory_space<vmem>>, vector<4x256xf32>
    tpu.vector_store %arg6[%c24_31, %c512_32], %42 {strides = array<i32>} : memref<32x2048xf32, #tpu.memory_space<vmem>>, vector<4x256xf32>,
    %c3 = arith.constant 3 : index
    %c0_33 = arith.constant 0 : index
    %c0_34 = arith.constant 0 : index
    %44 = vector.load %arg1[%c3, %c0_33, %c0_34] : memref<8x4x256xf32, #tpu.memory_space<vmem>>, vector<1x4x256xf32>
    %45 = vector.shape_cast %44 : vector<1x4x256xf32> to vector<4x256xf32>
    %cst_35 = arith.constant 0.000000e+00 : f32
    %46 = vector.broadcast %cst_35 : f32 to vector<4x1xf32>
    %cst_36 = arith.constant 0.000000e+00 : f32
    %47 = vector.broadcast %cst_36 : f32 to vector<4x2xf32>
    %48 = vector.extract_strided_slice %45 {offsets = [0, 0], sizes = [4, 255], strides = [1, 1]} : vector<4x256xf32> to vector<4x255xf32>
    %49 = tpu.concatenate %46, %48 in 1 : vector<4x1xf32>, vector<4x255xf32> -> vector<4x256xf32>
    %c0_37 = arith.constant 0 : index
    %c768 = arith.constant 768 : index
    %50 = vector.load %arg6[%c0_37, %c768] : memref<32x2048xf32, #tpu.memory_space<vmem>>, vector<4x256xf32>
    tpu.vector_store %arg6[%c0_37, %c768], %49 {strides = array<i32>} : memref<32x2048xf32, #tpu.memory_space<vmem>>, vector<4x256xf32>,
    %c8_38 = arith.constant 8 : index
    %c768_39 = arith.constant 768 : index
    %51 = vector.load %arg6[%c8_38, %c768_39] : memref<32x2048xf32, #tpu.memory_space<vmem>>, vector<4x256xf32>
    tpu.vector_store %arg6[%c8_38, %c768_39], %45 {strides = array<i32>} : memref<32x2048xf32, #tpu.memory_space<vmem>>, vector<4x256xf32>,
    %52 = vector.extract_strided_slice %45 {offsets = [0, 1], sizes = [4, 255], strides = [1, 1]} : vector<4x256xf32> to vector<4x255xf32>
    %53 = tpu.concatenate %52, %46 in 1 : vector<4x255xf32>, vector<4x1xf32> -> vector<4x256xf32>
    %c16_40 = arith.constant 16 : index
    %c768_41 = arith.constant 768 : index
    %54 = vector.load %arg6[%c16_40, %c768_41] : memref<32x2048xf32, #tpu.memory_space<vmem>>, vector<4x256xf32>
    tpu.vector_store %arg6[%c16_40, %c768_41], %53 {strides = array<i32>} : memref<32x2048xf32, #tpu.memory_space<vmem>>, vector<4x256xf32>,
    %55 = vector.extract_strided_slice %45 {offsets = [0, 2], sizes = [4, 254], strides = [1, 1]} : vector<4x256xf32> to vector<4x254xf32>
    %56 = tpu.concatenate %55, %47 in 1 : vector<4x254xf32>, vector<4x2xf32> -> vector<4x256xf32>
    %c24_42 = arith.constant 24 : index
    %c768_43 = arith.constant 768 : index
    %57 = vector.load %arg6[%c24_42, %c768_43] : memref<32x2048xf32, #tpu.memory_space<vmem>>, vector<4x256xf32>
    tpu.vector_store %arg6[%c24_42, %c768_43], %56 {strides = array<i32>} : memref<32x2048xf32, #tpu.memory_space<vmem>>, vector<4x256xf32>,
    %c4 = arith.constant 4 : index
    %c0_44 = arith.constant 0 : index
    %c0_45 = arith.constant 0 : index
    %58 = vector.load %arg1[%c4, %c0_44, %c0_45] : memref<8x4x256xf32, #tpu.memory_space<vmem>>, vector<1x4x256xf32>
    %59 = vector.shape_cast %58 : vector<1x4x256xf32> to vector<4x256xf32>
    %cst_46 = arith.constant 0.000000e+00 : f32
    %60 = vector.broadcast %cst_46 : f32 to vector<4x1xf32>
    %cst_47 = arith.constant 0.000000e+00 : f32
    %61 = vector.broadcast %cst_47 : f32 to vector<4x2xf32>
    %62 = vector.extract_strided_slice %59 {offsets = [0, 0], sizes = [4, 255], strides = [1, 1]} : vector<4x256xf32> to vector<4x255xf32>
    %63 = tpu.concatenate %60, %62 in 1 : vector<4x1xf32>, vector<4x255xf32> -> vector<4x256xf32>
    %c0_48 = arith.constant 0 : index
    %c1024 = arith.constant 1024 : index
    %64 = vector.load %arg6[%c0_48, %c1024] : memref<32x2048xf32, #tpu.memory_space<vmem>>, vector<4x256xf32>
    tpu.vector_store %arg6[%c0_48, %c1024], %63 {strides = array<i32>} : memref<32x2048xf32, #tpu.memory_space<vmem>>, vector<4x256xf32>,
    %c8_49 = arith.constant 8 : index
    %c1024_50 = arith.constant 1024 : index
    %65 = vector.load %arg6[%c8_49, %c1024_50] : memref<32x2048xf32, #tpu.memory_space<vmem>>, vector<4x256xf32>
    tpu.vector_store %arg6[%c8_49, %c1024_50], %59 {strides = array<i32>} : memref<32x2048xf32, #tpu.memory_space<vmem>>, vector<4x256xf32>,
    %66 = vector.extract_strided_slice %59 {offsets = [0, 1], sizes = [4, 255], strides = [1, 1]} : vector<4x256xf32> to vector<4x255xf32>
    %67 = tpu.concatenate %66, %60 in 1 : vector<4x255xf32>, vector<4x1xf32> -> vector<4x256xf32>
    %c16_51 = arith.constant 16 : index
    %c1024_52 = arith.constant 1024 : index
    %68 = vector.load %arg6[%c16_51, %c1024_52] : memref<32x2048xf32, #tpu.memory_space<vmem>>, vector<4x256xf32>
    tpu.vector_store %arg6[%c16_51, %c1024_52], %67 {strides = array<i32>} : memref<32x2048xf32, #tpu.memory_space<vmem>>, vector<4x256xf32>,
    %69 = vector.extract_strided_slice %59 {offsets = [0, 2], sizes = [4, 254], strides = [1, 1]} : vector<4x256xf32> to vector<4x254xf32>
    %70 = tpu.concatenate %69, %61 in 1 : vector<4x254xf32>, vector<4x2xf32> -> vector<4x256xf32>
    %c24_53 = arith.constant 24 : index
    %c1024_54 = arith.constant 1024 : index
    %71 = vector.load %arg6[%c24_53, %c1024_54] : memref<32x2048xf32, #tpu.memory_space<vmem>>, vector<4x256xf32>
    tpu.vector_store %arg6[%c24_53, %c1024_54], %70 {strides = array<i32>} : memref<32x2048xf32, #tpu.memory_space<vmem>>, vector<4x256xf32>,
    %c5 = arith.constant 5 : index
    %c0_55 = arith.constant 0 : index
    %c0_56 = arith.constant 0 : index
    %72 = vector.load %arg1[%c5, %c0_55, %c0_56] : memref<8x4x256xf32, #tpu.memory_space<vmem>>, vector<1x4x256xf32>
    %73 = vector.shape_cast %72 : vector<1x4x256xf32> to vector<4x256xf32>
    %cst_57 = arith.constant 0.000000e+00 : f32
    %74 = vector.broadcast %cst_57 : f32 to vector<4x1xf32>
    %cst_58 = arith.constant 0.000000e+00 : f32
    %75 = vector.broadcast %cst_58 : f32 to vector<4x2xf32>
    %76 = vector.extract_strided_slice %73 {offsets = [0, 0], sizes = [4, 255], strides = [1, 1]} : vector<4x256xf32> to vector<4x255xf32>
    %77 = tpu.concatenate %74, %76 in 1 : vector<4x1xf32>, vector<4x255xf32> -> vector<4x256xf32>
    %c0_59 = arith.constant 0 : index
    %c1280 = arith.constant 1280 : index
    %78 = vector.load %arg6[%c0_59, %c1280] : memref<32x2048xf32, #tpu.memory_space<vmem>>, vector<4x256xf32>
    tpu.vector_store %arg6[%c0_59, %c1280], %77 {strides = array<i32>} : memref<32x2048xf32, #tpu.memory_space<vmem>>, vector<4x256xf32>,
    %c8_60 = arith.constant 8 : index
    %c1280_61 = arith.constant 1280 : index
    %79 = vector.load %arg6[%c8_60, %c1280_61] : memref<32x2048xf32, #tpu.memory_space<vmem>>, vector<4x256xf32>
    tpu.vector_store %arg6[%c8_60, %c1280_61], %73 {strides = array<i32>} : memref<32x2048xf32, #tpu.memory_space<vmem>>, vector<4x256xf32>,
    %80 = vector.extract_strided_slice %73 {offsets = [0, 1], sizes = [4, 255], strides = [1, 1]} : vector<4x256xf32> to vector<4x255xf32>
    %81 = tpu.concatenate %80, %74 in 1 : vector<4x255xf32>, vector<4x1xf32> -> vector<4x256xf32>
    %c16_62 = arith.constant 16 : index
    %c1280_63 = arith.constant 1280 : index
    %82 = vector.load %arg6[%c16_62, %c1280_63] : memref<32x2048xf32, #tpu.memory_space<vmem>>, vector<4x256xf32>
    tpu.vector_store %arg6[%c16_62, %c1280_63], %81 {strides = array<i32>} : memref<32x2048xf32, #tpu.memory_space<vmem>>, vector<4x256xf32>,
    %83 = vector.extract_strided_slice %73 {offsets = [0, 2], sizes = [4, 254], strides = [1, 1]} : vector<4x256xf32> to vector<4x254xf32>
    %84 = tpu.concatenate %83, %75 in 1 : vector<4x254xf32>, vector<4x2xf32> -> vector<4x256xf32>
    %c24_64 = arith.constant 24 : index
    %c1280_65 = arith.constant 1280 : index
    %85 = vector.load %arg6[%c24_64, %c1280_65] : memref<32x2048xf32, #tpu.memory_space<vmem>>, vector<4x256xf32>
    tpu.vector_store %arg6[%c24_64, %c1280_65], %84 {strides = array<i32>} : memref<32x2048xf32, #tpu.memory_space<vmem>>, vector<4x256xf32>,
    %c6 = arith.constant 6 : index
    %c0_66 = arith.constant 0 : index
    %c0_67 = arith.constant 0 : index
    %86 = vector.load %arg1[%c6, %c0_66, %c0_67] : memref<8x4x256xf32, #tpu.memory_space<vmem>>, vector<1x4x256xf32>
    %87 = vector.shape_cast %86 : vector<1x4x256xf32> to vector<4x256xf32>
    %cst_68 = arith.constant 0.000000e+00 : f32
    %88 = vector.broadcast %cst_68 : f32 to vector<4x1xf32>
    %cst_69 = arith.constant 0.000000e+00 : f32
    %89 = vector.broadcast %cst_69 : f32 to vector<4x2xf32>
    %90 = vector.extract_strided_slice %87 {offsets = [0, 0], sizes = [4, 255], strides = [1, 1]} : vector<4x256xf32> to vector<4x255xf32>
    %91 = tpu.concatenate %88, %90 in 1 : vector<4x1xf32>, vector<4x255xf32> -> vector<4x256xf32>
    %c0_70 = arith.constant 0 : index
    %c1536 = arith.constant 1536 : index
    %92 = vector.load %arg6[%c0_70, %c1536] : memref<32x2048xf32, #tpu.memory_space<vmem>>, vector<4x256xf32>
    tpu.vector_store %arg6[%c0_70, %c1536], %91 {strides = array<i32>} : memref<32x2048xf32, #tpu.memory_space<vmem>>, vector<4x256xf32>,
    %c8_71 = arith.constant 8 : index
    %c1536_72 = arith.constant 1536 : index
    %93 = vector.load %arg6[%c8_71, %c1536_72] : memref<32x2048xf32, #tpu.memory_space<vmem>>, vector<4x256xf32>
    tpu.vector_store %arg6[%c8_71, %c1536_72], %87 {strides = array<i32>} : memref<32x2048xf32, #tpu.memory_space<vmem>>, vector<4x256xf32>,
    %94 = vector.extract_strided_slice %87 {offsets = [0, 1], sizes = [4, 255], strides = [1, 1]} : vector<4x256xf32> to vector<4x255xf32>
    %95 = tpu.concatenate %94, %88 in 1 : vector<4x255xf32>, vector<4x1xf32> -> vector<4x256xf32>
    %c16_73 = arith.constant 16 : index
    %c1536_74 = arith.constant 1536 : index
    %96 = vector.load %arg6[%c16_73, %c1536_74] : memref<32x2048xf32, #tpu.memory_space<vmem>>, vector<4x256xf32>
    tpu.vector_store %arg6[%c16_73, %c1536_74], %95 {strides = array<i32>} : memref<32x2048xf32, #tpu.memory_space<vmem>>, vector<4x256xf32>,
    %97 = vector.extract_strided_slice %87 {offsets = [0, 2], sizes = [4, 254], strides = [1, 1]} : vector<4x256xf32> to vector<4x254xf32>
    %98 = tpu.concatenate %97, %89 in 1 : vector<4x254xf32>, vector<4x2xf32> -> vector<4x256xf32>
    %c24_75 = arith.constant 24 : index
    %c1536_76 = arith.constant 1536 : index
    %99 = vector.load %arg6[%c24_75, %c1536_76] : memref<32x2048xf32, #tpu.memory_space<vmem>>, vector<4x256xf32>
    tpu.vector_store %arg6[%c24_75, %c1536_76], %98 {strides = array<i32>} : memref<32x2048xf32, #tpu.memory_space<vmem>>, vector<4x256xf32>,
    %c7 = arith.constant 7 : index
    %c0_77 = arith.constant 0 : index
    %c0_78 = arith.constant 0 : index
    %100 = vector.load %arg1[%c7, %c0_77, %c0_78] : memref<8x4x256xf32, #tpu.memory_space<vmem>>, vector<1x4x256xf32>
    %101 = vector.shape_cast %100 : vector<1x4x256xf32> to vector<4x256xf32>
    %cst_79 = arith.constant 0.000000e+00 : f32
    %102 = vector.broadcast %cst_79 : f32 to vector<4x1xf32>
    %cst_80 = arith.constant 0.000000e+00 : f32
    %103 = vector.broadcast %cst_80 : f32 to vector<4x2xf32>
    %104 = vector.extract_strided_slice %101 {offsets = [0, 0], sizes = [4, 255], strides = [1, 1]} : vector<4x256xf32> to vector<4x255xf32>
    %105 = tpu.concatenate %102, %104 in 1 : vector<4x1xf32>, vector<4x255xf32> -> vector<4x256xf32>
    %c0_81 = arith.constant 0 : index
    %c1792 = arith.constant 1792 : index
    %106 = vector.load %arg6[%c0_81, %c1792] : memref<32x2048xf32, #tpu.memory_space<vmem>>, vector<4x256xf32>
    tpu.vector_store %arg6[%c0_81, %c1792], %105 {strides = array<i32>} : memref<32x2048xf32, #tpu.memory_space<vmem>>, vector<4x256xf32>,
    %c8_82 = arith.constant 8 : index
    %c1792_83 = arith.constant 1792 : index
    %107 = vector.load %arg6[%c8_82, %c1792_83] : memref<32x2048xf32, #tpu.memory_space<vmem>>, vector<4x256xf32>
    tpu.vector_store %arg6[%c8_82, %c1792_83], %101 {strides = array<i32>} : memref<32x2048xf32, #tpu.memory_space<vmem>>, vector<4x256xf32>,
    %108 = vector.extract_strided_slice %101 {offsets = [0, 1], sizes = [4, 255], strides = [1, 1]} : vector<4x256xf32> to vector<4x255xf32>
    %109 = tpu.concatenate %108, %102 in 1 : vector<4x255xf32>, vector<4x1xf32> -> vector<4x256xf32>
    %c16_84 = arith.constant 16 : index
    %c1792_85 = arith.constant 1792 : index
    %110 = vector.load %arg6[%c16_84, %c1792_85] : memref<32x2048xf32, #tpu.memory_space<vmem>>, vector<4x256xf32>
    tpu.vector_store %arg6[%c16_84, %c1792_85], %109 {strides = array<i32>} : memref<32x2048xf32, #tpu.memory_space<vmem>>, vector<4x256xf32>,
    %111 = vector.extract_strided_slice %101 {offsets = [0, 2], sizes = [4, 254], strides = [1, 1]} : vector<4x256xf32> to vector<4x254xf32>
    %112 = tpu.concatenate %111, %103 in 1 : vector<4x254xf32>, vector<4x2xf32> -> vector<4x256xf32>
    %c24_86 = arith.constant 24 : index
    %c1792_87 = arith.constant 1792 : index
    %113 = vector.load %arg6[%c24_86, %c1792_87] : memref<32x2048xf32, #tpu.memory_space<vmem>>, vector<4x256xf32>
    tpu.vector_store %arg6[%c24_86, %c1792_87], %112 {strides = array<i32>} : memref<32x2048xf32, #tpu.memory_space<vmem>>, vector<4x256xf32>,
    %c0_88 = arith.constant 0 : index
    %c0_89 = arith.constant 0 : index
    %114 = vector.load %arg2[%c0_88, %c0_89] : memref<8x32xf32, #tpu.memory_space<vmem>>, vector<8x32xf32>
    %c0_90 = arith.constant 0 : index
    %c0_91 = arith.constant 0 : index
    %115 = vector.load %arg6[%c0_90, %c0_91] : memref<32x2048xf32, #tpu.memory_space<vmem>>, vector<32x2048xf32>
    %cst_92 = arith.constant dense<0.000000e+00> : vector<8x2048xf32>
    %116 = tpu.matmul %114, %115, %cst_92 {dimension_numbers = #tpu.dot_dimension_numbers<[1], [0], [0], [1], [0, 0, 1, 1], [], []>} : vector<8x32xf32>, vector<32x2048xf32>, vector<8x2048xf32> -> vector<8x2048xf32>
    %117 = vector.extract_strided_slice %116 {offsets = [0, 1], sizes = [8, 2047], strides = [1, 1]} : vector<8x2048xf32> to vector<8x2047xf32>
    %cst_93 = arith.constant 0.000000e+00 : f32
    %118 = vector.broadcast %cst_93 : f32 to vector<8x1xf32>
    %119 = tpu.concatenate %117, %118 in 1 : vector<8x2047xf32>, vector<8x1xf32> -> vector<8x2048xf32>
    %120 = arith.maximumf %116, %119 : vector<8x2048xf32>
    %c0_94 = arith.constant 0 : index
    %c0_95 = arith.constant 0 : index
    %121 = vector.load %arg4[%c0_94, %c0_95] : memref<256x128xf32, #tpu.memory_space<vmem>>, vector<256x128xf32>
    %c0_96 = arith.constant 0 : index
    %c0_97 = arith.constant 0 : index
    %122 = vector.load %arg3[%c0_96, %c0_97] : memref<8x1xf32, #tpu.memory_space<vmem>>, vector<8x1xf32>
    %123 = vector.extract_strided_slice %120 {offsets = [0, 0], sizes = [8, 256], strides = [1, 1]} : vector<8x2048xf32> to vector<8x256xf32>
    %cst_98 = arith.constant dense<0.000000e+00> : vector<8x128xf32>
    %124 = tpu.matmul %123, %121, %cst_98 {dimension_numbers = #tpu.dot_dimension_numbers<[1], [0], [0], [1], [0, 0, 1, 1], [], []>} : vector<8x256xf32>, vector<256x128xf32>, vector<8x128xf32> -> vector<8x128xf32>
    %125 = vector.broadcast %122 : vector<8x1xf32> to vector<8x128xf32>
    %126 = arith.addf %124, %125 : vector<8x128xf32>
    %cst_99 = arith.constant 2.000000e-01 : f32
    %127 = vector.broadcast %cst_99 : f32 to vector<8x128xf32>
    %128 = arith.mulf %127, %126 : vector<8x128xf32>
    %129 = arith.maximumf %126, %128 : vector<8x128xf32>
    %c0_100 = arith.constant 0 : index
    %c0_101 = arith.constant 0 : index
    %c0_102 = arith.constant 0 : index
    %130 = vector.load %arg5[%c0_100, %c0_101, %c0_102] : memref<8x8x128xf32, #tpu.memory_space<vmem>>, vector<1x8x128xf32>
    %131 = vector.shape_cast %130 : vector<1x8x128xf32> to vector<8x128xf32>
    %132 = vector.shape_cast %129 : vector<8x128xf32> to vector<1x8x128xf32>
    tpu.vector_store %arg5[%c0_100, %c0_101, %c0_102], %132 {strides = array<i32>} : memref<8x8x128xf32, #tpu.memory_space<vmem>>, vector<1x8x128xf32>,
    %133 = vector.extract_strided_slice %120 {offsets = [0, 256], sizes = [8, 256], strides = [1, 1]} : vector<8x2048xf32> to vector<8x256xf32>
    %cst_103 = arith.constant dense<0.000000e+00> : vector<8x128xf32>
    %134 = tpu.matmul %133, %121, %cst_103 {dimension_numbers = #tpu.dot_dimension_numbers<[1], [0], [0], [1], [0, 0, 1, 1], [], []>} : vector<8x256xf32>, vector<256x128xf32>, vector<8x128xf32> -> vector<8x128xf32>
    %135 = vector.broadcast %122 : vector<8x1xf32> to vector<8x128xf32>
    %136 = arith.addf %134, %135 : vector<8x128xf32>
    %cst_104 = arith.constant 2.000000e-01 : f32
    %137 = vector.broadcast %cst_104 : f32 to vector<8x128xf32>
    %138 = arith.mulf %137, %136 : vector<8x128xf32>
    %139 = arith.maximumf %136, %138 : vector<8x128xf32>
    %c1_105 = arith.constant 1 : index
    %c0_106 = arith.constant 0 : index
    %c0_107 = arith.constant 0 : index
    %140 = vector.load %arg5[%c1_105, %c0_106, %c0_107] : memref<8x8x128xf32, #tpu.memory_space<vmem>>, vector<1x8x128xf32>
    %141 = vector.shape_cast %140 : vector<1x8x128xf32> to vector<8x128xf32>
    %142 = vector.shape_cast %139 : vector<8x128xf32> to vector<1x8x128xf32>
    tpu.vector_store %arg5[%c1_105, %c0_106, %c0_107], %142 {strides = array<i32>} : memref<8x8x128xf32, #tpu.memory_space<vmem>>, vector<1x8x128xf32>,
    %143 = vector.extract_strided_slice %120 {offsets = [0, 512], sizes = [8, 256], strides = [1, 1]} : vector<8x2048xf32> to vector<8x256xf32>
    %cst_108 = arith.constant dense<0.000000e+00> : vector<8x128xf32>
    %144 = tpu.matmul %143, %121, %cst_108 {dimension_numbers = #tpu.dot_dimension_numbers<[1], [0], [0], [1], [0, 0, 1, 1], [], []>} : vector<8x256xf32>, vector<256x128xf32>, vector<8x128xf32> -> vector<8x128xf32>
    %145 = vector.broadcast %122 : vector<8x1xf32> to vector<8x128xf32>
    %146 = arith.addf %144, %145 : vector<8x128xf32>
    %cst_109 = arith.constant 2.000000e-01 : f32
    %147 = vector.broadcast %cst_109 : f32 to vector<8x128xf32>
    %148 = arith.mulf %147, %146 : vector<8x128xf32>
    %149 = arith.maximumf %146, %148 : vector<8x128xf32>
    %c2_110 = arith.constant 2 : index
    %c0_111 = arith.constant 0 : index
    %c0_112 = arith.constant 0 : index
    %150 = vector.load %arg5[%c2_110, %c0_111, %c0_112] : memref<8x8x128xf32, #tpu.memory_space<vmem>>, vector<1x8x128xf32>
    %151 = vector.shape_cast %150 : vector<1x8x128xf32> to vector<8x128xf32>
    %152 = vector.shape_cast %149 : vector<8x128xf32> to vector<1x8x128xf32>
    tpu.vector_store %arg5[%c2_110, %c0_111, %c0_112], %152 {strides = array<i32>} : memref<8x8x128xf32, #tpu.memory_space<vmem>>, vector<1x8x128xf32>,
    %153 = vector.extract_strided_slice %120 {offsets = [0, 768], sizes = [8, 256], strides = [1, 1]} : vector<8x2048xf32> to vector<8x256xf32>
    %cst_113 = arith.constant dense<0.000000e+00> : vector<8x128xf32>
    %154 = tpu.matmul %153, %121, %cst_113 {dimension_numbers = #tpu.dot_dimension_numbers<[1], [0], [0], [1], [0, 0, 1, 1], [], []>} : vector<8x256xf32>, vector<256x128xf32>, vector<8x128xf32> -> vector<8x128xf32>
    %155 = vector.broadcast %122 : vector<8x1xf32> to vector<8x128xf32>
    %156 = arith.addf %154, %155 : vector<8x128xf32>
    %cst_114 = arith.constant 2.000000e-01 : f32
    %157 = vector.broadcast %cst_114 : f32 to vector<8x128xf32>
    %158 = arith.mulf %157, %156 : vector<8x128xf32>
    %159 = arith.maximumf %156, %158 : vector<8x128xf32>
    %c3_115 = arith.constant 3 : index
    %c0_116 = arith.constant 0 : index
    %c0_117 = arith.constant 0 : index
    %160 = vector.load %arg5[%c3_115, %c0_116, %c0_117] : memref<8x8x128xf32, #tpu.memory_space<vmem>>, vector<1x8x128xf32>
    %161 = vector.shape_cast %160 : vector<1x8x128xf32> to vector<8x128xf32>
    %162 = vector.shape_cast %159 : vector<8x128xf32> to vector<1x8x128xf32>
    tpu.vector_store %arg5[%c3_115, %c0_116, %c0_117], %162 {strides = array<i32>} : memref<8x8x128xf32, #tpu.memory_space<vmem>>, vector<1x8x128xf32>,
    %163 = vector.extract_strided_slice %120 {offsets = [0, 1024], sizes = [8, 256], strides = [1, 1]} : vector<8x2048xf32> to vector<8x256xf32>
    %cst_118 = arith.constant dense<0.000000e+00> : vector<8x128xf32>
    %164 = tpu.matmul %163, %121, %cst_118 {dimension_numbers = #tpu.dot_dimension_numbers<[1], [0], [0], [1], [0, 0, 1, 1], [], []>} : vector<8x256xf32>, vector<256x128xf32>, vector<8x128xf32> -> vector<8x128xf32>
    %165 = vector.broadcast %122 : vector<8x1xf32> to vector<8x128xf32>
    %166 = arith.addf %164, %165 : vector<8x128xf32>
    %cst_119 = arith.constant 2.000000e-01 : f32
    %167 = vector.broadcast %cst_119 : f32 to vector<8x128xf32>
    %168 = arith.mulf %167, %166 : vector<8x128xf32>
    %169 = arith.maximumf %166, %168 : vector<8x128xf32>
    %c4_120 = arith.constant 4 : index
    %c0_121 = arith.constant 0 : index
    %c0_122 = arith.constant 0 : index
    %170 = vector.load %arg5[%c4_120, %c0_121, %c0_122] : memref<8x8x128xf32, #tpu.memory_space<vmem>>, vector<1x8x128xf32>
    %171 = vector.shape_cast %170 : vector<1x8x128xf32> to vector<8x128xf32>
    %172 = vector.shape_cast %169 : vector<8x128xf32> to vector<1x8x128xf32>
    tpu.vector_store %arg5[%c4_120, %c0_121, %c0_122], %172 {strides = array<i32>} : memref<8x8x128xf32, #tpu.memory_space<vmem>>, vector<1x8x128xf32>,
    %173 = vector.extract_strided_slice %120 {offsets = [0, 1280], sizes = [8, 256], strides = [1, 1]} : vector<8x2048xf32> to vector<8x256xf32>
    %cst_123 = arith.constant dense<0.000000e+00> : vector<8x128xf32>
    %174 = tpu.matmul %173, %121, %cst_123 {dimension_numbers = #tpu.dot_dimension_numbers<[1], [0], [0], [1], [0, 0, 1, 1], [], []>} : vector<8x256xf32>, vector<256x128xf32>, vector<8x128xf32> -> vector<8x128xf32>
    %175 = vector.broadcast %122 : vector<8x1xf32> to vector<8x128xf32>
    %176 = arith.addf %174, %175 : vector<8x128xf32>
    %cst_124 = arith.constant 2.000000e-01 : f32
    %177 = vector.broadcast %cst_124 : f32 to vector<8x128xf32>
    %178 = arith.mulf %177, %176 : vector<8x128xf32>
    %179 = arith.maximumf %176, %178 : vector<8x128xf32>
    %c5_125 = arith.constant 5 : index
    %c0_126 = arith.constant 0 : index
    %c0_127 = arith.constant 0 : index
    %180 = vector.load %arg5[%c5_125, %c0_126, %c0_127] : memref<8x8x128xf32, #tpu.memory_space<vmem>>, vector<1x8x128xf32>
    %181 = vector.shape_cast %180 : vector<1x8x128xf32> to vector<8x128xf32>
    %182 = vector.shape_cast %179 : vector<8x128xf32> to vector<1x8x128xf32>
    tpu.vector_store %arg5[%c5_125, %c0_126, %c0_127], %182 {strides = array<i32>} : memref<8x8x128xf32, #tpu.memory_space<vmem>>, vector<1x8x128xf32>,
    %183 = vector.extract_strided_slice %120 {offsets = [0, 1536], sizes = [8, 256], strides = [1, 1]} : vector<8x2048xf32> to vector<8x256xf32>
    %cst_128 = arith.constant dense<0.000000e+00> : vector<8x128xf32>
    %184 = tpu.matmul %183, %121, %cst_128 {dimension_numbers = #tpu.dot_dimension_numbers<[1], [0], [0], [1], [0, 0, 1, 1], [], []>} : vector<8x256xf32>, vector<256x128xf32>, vector<8x128xf32> -> vector<8x128xf32>
    %185 = vector.broadcast %122 : vector<8x1xf32> to vector<8x128xf32>
    %186 = arith.addf %184, %185 : vector<8x128xf32>
    %cst_129 = arith.constant 2.000000e-01 : f32
    %187 = vector.broadcast %cst_129 : f32 to vector<8x128xf32>
    %188 = arith.mulf %187, %186 : vector<8x128xf32>
    %189 = arith.maximumf %186, %188 : vector<8x128xf32>
    %c6_130 = arith.constant 6 : index
    %c0_131 = arith.constant 0 : index
    %c0_132 = arith.constant 0 : index
    %190 = vector.load %arg5[%c6_130, %c0_131, %c0_132] : memref<8x8x128xf32, #tpu.memory_space<vmem>>, vector<1x8x128xf32>
    %191 = vector.shape_cast %190 : vector<1x8x128xf32> to vector<8x128xf32>
    %192 = vector.shape_cast %189 : vector<8x128xf32> to vector<1x8x128xf32>
    tpu.vector_store %arg5[%c6_130, %c0_131, %c0_132], %192 {strides = array<i32>} : memref<8x8x128xf32, #tpu.memory_space<vmem>>, vector<1x8x128xf32>,
    %193 = vector.extract_strided_slice %120 {offsets = [0, 1792], sizes = [8, 256], strides = [1, 1]} : vector<8x2048xf32> to vector<8x256xf32>
    %cst_133 = arith.constant dense<0.000000e+00> : vector<8x128xf32>
    %194 = tpu.matmul %193, %121, %cst_133 {dimension_numbers = #tpu.dot_dimension_numbers<[1], [0], [0], [1], [0, 0, 1, 1], [], []>} : vector<8x256xf32>, vector<256x128xf32>, vector<8x128xf32> -> vector<8x128xf32>
    %195 = vector.broadcast %122 : vector<8x1xf32> to vector<8x128xf32>
    %196 = arith.addf %194, %195 : vector<8x128xf32>
    %cst_134 = arith.constant 2.000000e-01 : f32
    %197 = vector.broadcast %cst_134 : f32 to vector<8x128xf32>
    %198 = arith.mulf %197, %196 : vector<8x128xf32>
    %199 = arith.maximumf %196, %198 : vector<8x128xf32>
    %c7_135 = arith.constant 7 : index
    %c0_136 = arith.constant 0 : index
    %c0_137 = arith.constant 0 : index
    %200 = vector.load %arg5[%c7_135, %c0_136, %c0_137] : memref<8x8x128xf32, #tpu.memory_space<vmem>>, vector<1x8x128xf32>
    %201 = vector.shape_cast %200 : vector<1x8x128xf32> to vector<8x128xf32>
    %202 = vector.shape_cast %199 : vector<8x128xf32> to vector<1x8x128xf32>
    tpu.vector_store %arg5[%c7_135, %c0_136, %c0_137], %202 {strides = array<i32>} : memref<8x8x128xf32, #tpu.memory_space<vmem>>, vector<1x8x128xf32>,
    return
  }
  func.func @transform_0(%arg0: i32) -> (i32, i32, i32) {
    %c0_i32 = arith.constant 0 : i32
    %c0_i32_0 = arith.constant 0 : i32
    %c0_i32_1 = arith.constant 0 : i32
    return %arg0, %c0_i32, %c0_i32_0 : i32, i32, i32
  }
  func.func @transform_1(%arg0: i32) -> (i32, i32) {
    %c0_i32 = arith.constant 0 : i32
    %c0_i32_0 = arith.constant 0 : i32
    %c0_i32_1 = arith.constant 0 : i32
    return %c0_i32, %c0_i32_0 : i32, i32
  }
  func.func @transform_2(%arg0: i32) -> (i32, i32) {
    %c0_i32 = arith.constant 0 : i32
    %c0_i32_0 = arith.constant 0 : i32
    %c0_i32_1 = arith.constant 0 : i32
    return %c0_i32, %c0_i32_0 : i32, i32
  }
  func.func @transform_3(%arg0: i32) -> (i32, i32) {
    %c0_i32 = arith.constant 0 : i32
    %c0_i32_0 = arith.constant 0 : i32
    %c0_i32_1 = arith.constant 0 : i32
    return %c0_i32, %c0_i32_0 : i32, i32
  }
  func.func @transform_4(%arg0: i32) -> (i32, i32, i32) {
    %c0_i32 = arith.constant 0 : i32
    %c0_i32_0 = arith.constant 0 : i32
    %c0_i32_1 = arith.constant 0 : i32
    return %arg0, %c0_i32, %c0_i32_0 : i32, i32, i32
  }
}

</mosaic_0001>

<bundles_post_ra>
// kernel: tpu_custom_call.1
= control target key start
LH: loop header
LB: loop body
LE: loop exit
PB: predicated region body
PF: predicated region fallthrough
CT: control target
= control target key end

     0   :  { %9 = vsyncpa [#allocation4], 0  ;;  %s3490_s0 = inlined_call_operand.hbm [shape: f32[16,4,256], index: 0, kind: input, shape index: {}]   ;;  %s3491_s1 = inlined_call_operand.vmem [shape: f32[8,32], index: 1, kind: input, shape index: {}]   ;;  %s3492_s2 = inlined_call_operand.vmem [shape: f32[8,1], index: 2, kind: input, shape index: {}]   ;;  %s3493_s3 = inlined_call_operand.hbm [shape: f32[256,128], index: 3, kind: input, shape index: {}]   ;;  %s3494_s4 = inlined_call_operand.hbm [shape: f32[16,8,128], index: 4, kind: output, shape index: {}]  }
   0x1   :  { %11 = vsyncpa [#allocation4 + $0x1], 0 }
   0x2   :  { %12 = vsyncpa [#allocation7], 0 }
   0x3   :  { %13 = vsyncpa [#allocation5], 0 }
   0x4   :  { %15 = vsyncpa [#allocation5 + $0x1], 0  ;;  %s2649_s15 = smov 0   ;;  %s2651_s16 = smov 0  }
   0x5   :  { %s2653_s17 = smov 0   ;;  %s2655_s18 = smov 0  }
   0x6 LB: > { %s2670_s19 = sadd.s32 4294967295, %s2610_s18   ;;  %s2055_s20 = sadd.s32 4294967294, %s2610_s18   ;;  %s2610_s18 = sphi %s2655_s18, %s3516_s18   ;;  %s2606_s17 = sphi %s2653_s17, %s3515_s17   ;;  %s2602_s16 = sphi %s2651_s16, %s3514_s16   ;;  %s2598_s15 = sphi %s2649_s15, %s3513_s15  }
   0x7   : > { %p41_p0 = scmp.ne.s32.totalorder %s2602_s16, %s2598_s15  ;;  %p3495_p1 = scmp.eq.s32.totalorder %s2670_s19, 0 }
   0x8   : > { %p134_p3 = scmp.eq.s32.totalorder %s2055_s20, 1  ;;  %p2056_p5 = scmp.ge.s32.totalorder %s2610_s18, 1 }
   0x9   : > { %p2679_p4 = por %p3495_p1, %p41_p0  ;;  %p141_p7 = scmp.lt.s32.totalorder %s2610_s18, 3 }
   0xa   : > { %p2684_p6 = por %p134_p3, %p41_p0  ;;  %s2612_s24 = smov [#allocation6]  }
   0xb   : > { %s3499_s21 = scalar_select %p2679_p4, 1, 0 }
   0xc   : > { %s3500_s22 = scalar_select %p2684_p6, 1, 0 }
   0xd   : > { %p2689_p8 = pnand %p2056_p5, %p141_p7  ;;  %s159_s25 = sshll.u32 %s2612_s24, 4  ;;  %s160_s25 = int_to_ptr.vmem [resolvable:$true] %s159_s25 }
   0xe   : > { %s2703_s27 = sadd.s32 1, %s2610_s18   ;;  %s28_s28 = sadd.s32 1, %s2606_s17 }
   0xf   : > { %s3501_s23 = scalar_select %p2689_p8, 1, 0 }
  0x10   : > { %p2385_p9 = pneg %p2689_p8  ;;  %s25_s29 = ssub.s32 %s2610_s18, %s2703_s27 }
  0x11   : > { %s2499_s30 = scalar_lea.vmem %s160_s25, 4096  ;;  %p2507_p5 = scmp.lt.s32.totalorder %s160_s25, %s160_s25 }
  0x12   : > { %p2698_p11 = pnand %p2385_p9, %p3495_p1  ;;  %p2500_p13 = scmp.ne.s32.totalorder %s160_s25, %s2499_s30 }
  0x13   : > { %p2508_p7 = scmp.lt.s32.totalorder %s2499_s30, %s2499_s30 }
  0x14   : > { %p2490_p12 = pneg %p2698_p11 }
  0x15   : > { %p2509_p10 = por %p2508_p7, %p2507_p5 }
  0x16   : > { %p2502_p0 = pnand %p2500_p13, %p2490_p12 }
  0x18   : > { %p2503_p3 = pneg %p2502_p0 }
  0x1a   : > { %p2510_p2 = pnand %p2509_p10, %p2503_p3 }
  0x1c   : > { %2513 = shalt.err (!%p2510_p2)
}
  0x1d   : > { %s2613_s5 = smov 128   ;;  %s2614_s6 = smov 8  }
  0x1e   : > { %2388 = dma.hbm_to_vmem [thread:$0]  (!%p2698_p11), %s3493_s3, 4096, %s160_s25, [#allocation7], %s2613_s5, %s2613_s5, %s2614_s6  }
  0x1f   : > { %p26_p2 = scmp.eq.s32.totalorder %s25_s29, 0  ;;  %p35_p9 = scmp.ne.s32.totalorder %s2606_s17, %s2602_s16 }
  0x20   : > { %p36_p10 = scmp.eq.s32.totalorder %s2610_s18, 0  ;;  %p2398_p12 = scmp.lt.s32.totalorder %s2610_s18, 2 }
  0x21   : > { %s2723_s9 = scalar_select %p26_p2, %s2606_s17, %s28_s28  }
  0x22   : > { %p37_p13 = por %p36_p10, %p35_p9  ;;  %p3503_p0 = scmp.eq.s32.totalorder %s2670_s19, 1 }
  0x23   : > { %s173_s11 = sand.u32 1, %s2606_s17   ;;  %s2095_s12 = sshll.u32 %s2610_s18, 10 }
  0x24   : > { %p2727_p3 = por %p3503_p0, %p35_p9  ;;  %s2059_s13 = sshll.u32 %s173_s11, 6 }
  0x25   : > { %s2736_s24 = scalar_lea.hbm %s3490_s0, %s2095_s12  ;;  %s177_s25 = scalar_lea.vmem [#allocation3], %s2059_s13 }
  0x26   : > { %s3504_s10 = scalar_select %p2727_p3, 1, 0 }
  0x27   : > { %s185_s26 = sshll.u32 %s177_s25, 4  ;;  %p2738_p11 = pnand %p2398_p12, %p37_p13  ;;  %s2742_s26 = int_to_ptr.vmem [resolvable:$true] %s185_s26 }
  0x28   : > { %s2744_s29 = scalar_lea.sflag [#allocation4], %s173_s11  ;;  %s2514_s30 = scalar_lea.hbm %s2736_s24, 1024 }
  0x29   : > { %p2515_p5 = scmp.ne.s32.totalorder %s2736_s24, %s2514_s30  ;;  %p2516_p7 = pneg %p2738_p11 }
  0x2a   : > { %s2519_s12 = scalar_lea.hbm %s3490_s0, 2048  ;;  %p2520_p10 = scmp.lt.s32.totalorder %s2736_s24, %s3490_s0 }
  0x2b   : > { %p2517_p2 = pnand %p2516_p7, %p2515_p5  ;;  %p2521_p12 = scmp.lt.s32.totalorder %s2519_s12, %s2514_s30 }
  0x2d   : > { %p2518_p9 = pneg %p2517_p2  ;;  %p2522_p13 = por %p2521_p12, %p2520_p10 }
  0x2f   : > { %p2523_p0 = pnand %p2522_p13, %p2518_p9 }
  0x31   : > { %2526 = shalt.err (!%p2523_p0)
}
  0x32   : > { %s2527_s11 = scalar_lea.vmem %s2742_s26, 1024  ;;  %s2615_s20 = smov [#allocation3]  }
  0x33   : > { %p2528_p1 = scmp.ne.s32.totalorder %s2742_s26, %s2527_s11  ;;  %s2532_s25 = sshll.u32 %s2615_s20, 4  ;;  %s2533_s25 = int_to_ptr.vmem [resolvable:$false] %s2532_s25 }
  0x34   : > { %s2534_s7 = scalar_lea.vmem %s2533_s25, 2048  ;;  %p2535_p2 = scmp.lt.s32.totalorder %s2742_s26, %s2533_s25 }
  0x35   : > { %p2530_p6 = pnand %p2528_p1, %p2516_p7  ;;  %p2536_p3 = scmp.lt.s32.totalorder %s2534_s7, %s2527_s11 }
  0x37   : > { %p2531_p5 = pneg %p2530_p6  ;;  %p2537_p4 = por %p2536_p3, %p2535_p2 }
  0x39   : > { %p2538_p8 = pnand %p2537_p4, %p2531_p5 }
  0x3b   : > { %2541 = shalt.err (!%p2538_p8)
}
  0x3c   : > { %2392 = dma.hbm_to_vmem [thread:$0]  (!%p2738_p11), %s2736_s24, 1024, %s2742_s26, %s2744_s29, %s2613_s5, %s2613_s5, %s2614_s6  }
  0x3d   : > { %p3506_p1 = scmp.ne.s32.totalorder %s3501_s23, 0 }
  0x3e   : > { %s2771_s30 = sand.u32 (!%p3506_p1), 1, %s2602_s16   ;;  %p3507_p4 = scmp.ne.s32.totalorder (!%p3506_p1), %s3499_s21, 0 }
  0x3f   : > { %197 = sbr.rel (%p3506_p1) target bundleno = 866 (0x362), region = 36  ;;  %s2064_s8 = sshll.u32 (!%p3506_p1), %s2771_s30, 6 }
  0x40   : > { %s200_s12 = scalar_lea.sflag (!%p3506_p1), [#allocation4], %s2771_s30  ;;  %s2777_s28 = scalar_lea.vmem (!%p3506_p1), [#allocation3], %s2064_s8 }
  0x44   : > { %2585 = dma.done.wait (%p3507_p4), %s200_s12, 1024  }
  0x45   : > { %2587 = vsyncadd (%p3507_p4), %s200_s12, 4294966272  ;;  %p3508_p6 = scmp.eq.s32.totalorder %s2670_s19, 0 }
  0x47   : > { %2589 = dma.done.wait (%p3508_p6), [#allocation7], 4096   ;;  %p3509_p8 = pmov %p3508_p6 }
  0x48   : > { %v2616_v0 = vmov 0.0   ;;  %v298_v1 = vld [vmem:[%s2777_s28] sm:$0xff]  ;;  %v2067_v2 = vld [vmem:[%s2777_s28 + $0x8] sm:$0xff]  ;;  %v2068_v3 = vld [vmem:[%s2777_s28 + $0x10] sm:$0xff]  ;;  %s2617_s21 = smov 127   ;;  %s2618_s23 = smov 126  }
  0x49   : > { %2591 = vsyncadd (%p3509_p8), [#allocation7], 4294963200  ;;  %250 = vst [vmem:[#allocation2 + $0xe0] sm:$0xff] %v2616_v0  ;;  %729 = vmatprep.mubr.f32.mxu0 %v2616_v0  ;;  %800 = vmatprep.mubr.f32.mxu1 %v2616_v0  ;;  %v300_v4 = vcombine.high %v298_v1, %v298_v1  ;;  %v340_v5 = vcombine.high %v2067_v2, %v2067_v2  ;;  %v2069_v7 = vld [vmem:[%s2777_s28 + $0x18] sm:$0xff]  ;;  %v2070_v8 = vld [vmem:[%s2777_s28 + $0x20] sm:$0xff]  ;;  %s2619_s5 = smov 1  }
  0x4a   : > { %234 = vst [vmem:[#allocation2 + $0xb0] sm:$0xff] %v2616_v0  ;;  %235 = vst [vmem:[#allocation2 + $0x1b0] sm:$0xff] %v2616_v0  ;;  %315 = vrot.lane.b32.xlu1 %v298_v1, %s2617_s21  ;;  %326 = vrot.lane.b32.xlu0 %v298_v1, %s2618_s23  ;;  %v377_v6 = vcombine.high %v2068_v3, %v2068_v3  ;;  %v414_v9 = vcombine.high %v2069_v7, %v2069_v7  ;;  %v2071_v11 = vld [vmem:[%s2777_s28 + $0x28] sm:$0xff]  ;;  %v2072_v12 = vld [vmem:[%s2777_s28 + $0x30] sm:$0xff]  ;;  %vm305_vm0 = vcmask 7168   ;;  %vm319_vm1 = vcmask 1039360  }
  0x4b   : > { %236 = vst [vmem:[#allocation2 + $0xd8] sm:$0xff] %v2616_v0  ;;  %237 = vst [vmem:[#allocation2 + $0x18] sm:$0xff] %v2616_v0  ;;  %v451_v10 = vcombine.high %v2070_v8, %v2070_v8  ;;  %v2073_v13 = vld [vmem:[%s2777_s28 + $0x38] sm:$0xff]  ;;  %v488_v14 = vcombine.high %v2071_v11, %v2071_v11  ;;  %v525_v15 = vcombine.high %v2072_v12, %v2072_v12  ;;  %vm330_vm2 = vcmask 1031168   ;;  %v2924_v53 = vld [vmem:[%s3491_s1] sm:$0xff]  ;;  %s3430_s13 = scalar_lea.vmem [#allocation8], %s2064_s8 }
  0x4c   : > { %238 = vst [vmem:[#allocation2 + $0x50] sm:$0xff] %v2616_v0  ;;  %239 = vst [vmem:[#allocation2 + $0x168] sm:$0xff] %v2616_v0  ;;  %v562_v16 = vcombine.high %v2073_v13, %v2073_v13  ;;  %vm661_vm3 = vcmask 261120   ;;  %s2096_s14 = sshll.u32 %s2670_s19, 10  ;;  %s1972_s11 = sshll.u32 %s3430_s13, 4  ;;  %s3446_s11 = int_to_ptr.vmem [resolvable:$true] %s1972_s11 }
  0x4d   : > { %240 = vst [vmem:[#allocation2 + $0x130] sm:$0xff] %v2616_v0  ;;  %241 = vst [vmem:[#allocation2 + $0x48] sm:$0xff] %v2616_v0  ;;  %s3444_s7 = scalar_lea.hbm %s3494_s4, %s2096_s14  ;;  %s1959_s8 = scalar_lea.sflag [#allocation5], %s2771_s30 }
  0x4e   : > { %242 = vst [vmem:[#allocation2 + $0x180] sm:$0xff] %v2616_v0  ;;  %243 = vst [vmem:[#allocation2 + $0x110] sm:$0xff] %v2616_v0  ;;  %301 = vrot.lane.b32.xlu0 %v298_v1, %s2619_s5  ;;  %317 = vrot.lane.b32.xlu1 %v300_v4, %s2617_s21  ;;  %s2542_s12 = scalar_lea.vmem %s3446_s11, 1024  ;;  %p3510_p11 = scmp.ne.s32.totalorder %s3504_s10, 0 }
  0x4f   : > { %244 = vst [vmem:[#allocation2 + $0x118] sm:$0xff] %v2616_v0  ;;  %245 = vst [vmem:[#allocation2 + $0x98] sm:$0xff] %v2616_v0  ;;  %p2543_p3 = scmp.ne.s32.totalorder %s3446_s11, %s2542_s12  ;;  %s2621_s19 = smov [#allocation8]  }
  0x50   : > { %246 = vst [vmem:[#allocation2 + $0x120] sm:$0xff] %v2616_v0  ;;  %247 = vst [vmem:[#allocation2 + $0x150] sm:$0xff] %v2616_v0  ;;  %s2546_s28 = sshll.u32 %s2621_s19, 4  ;;  %s2547_s28 = int_to_ptr.vmem [resolvable:$false] %s2546_s28 }
  0x51   : > { %248 = vst [vmem:[#allocation2 + $0x108] sm:$0xff] %v2616_v0  ;;  %249 = vst [vmem:[#allocation2 + $0x60] sm:$0xff] %v2616_v0  ;;  %p2544_p7 = pnand %p2543_p3, %p3510_p11  ;;  %p2549_p10 = scmp.lt.s32.totalorder %s3446_s11, %s2547_s28 }
  0x52   : > { %251 = vst [vmem:[#allocation2 + $0x188] sm:$0xff] %v2616_v0  ;;  %252 = vst [vmem:[#allocation2 + $0x138] sm:$0xff] %v2616_v0  ;;  %303 = vrot.lane.b32.xlu1 %v300_v4, %s2619_s5  ;;  %328 = vrot.lane.b32.xlu0 %v300_v4, %s2618_s23 }
  0x53   : > { %253 = vst [vmem:[#allocation2 + $0x140] sm:$0xff] %v2616_v0  ;;  %254 = vst [vmem:[#allocation2 + $0x80] sm:$0xff] %v2616_v0  ;;  %p2545_p9 = pneg %p2544_p7 }
  0x54   : > { %255 = vst [vmem:[#allocation2 + $0x1a8] sm:$0xff] %v2616_v0  ;;  %256 = vst [vmem:[#allocation2 + $0x1b8] sm:$0xff] %v2616_v0 }
  0x55   : > { %257 = vst [vmem:[#allocation2 + $0x28] sm:$0xff] %v2616_v0  ;;  %258 = vst [vmem:[#allocation2 + $0x1e8] sm:$0xff] %v2616_v0 }
  0x56   : > { %259 = vst [vmem:[#allocation2 + $0xf8] sm:$0xff] %v2616_v0  ;;  %260 = vst [vmem:[#allocation2 + $0x160] sm:$0xff] %v2616_v0  ;;  %364 = vrot.lane.b32.xlu1 %v2067_v2, %s2618_s23  ;;  %366 = vrot.lane.b32.xlu0 %v340_v5, %s2618_s23 }
  0x57   : > { %261 = vst [vmem:[#allocation2 + $0x30] sm:$0xff] %v2616_v0  ;;  %262 = vst [vmem:[#allocation2 + $0x1e0] sm:$0xff] %v2616_v0 }
  0x58   : > { %263 = vst [vmem:[#allocation2] sm:$0xff] %v2616_v0  ;;  %264 = vst [vmem:[#allocation2 + $0xf0] sm:$0xff] %v2616_v0 }
  0x59   : > { %265 = vst [vmem:[#allocation2 + $0x8] sm:$0xff] %v2616_v0  ;;  %266 = vst [vmem:[#allocation2 + $0x148] sm:$0xff] %v2616_v0 }
  0x5a   : > { %267 = vst [vmem:[#allocation2 + $0x1d0] sm:$0xff] %v2616_v0  ;;  %268 = vst [vmem:[#allocation2 + $0x100] sm:$0xff] %v2616_v0  ;;  %403 = vrot.lane.b32.xlu1 %v377_v6, %s2618_s23  ;;  %356 = vrot.lane.b32.xlu0 %v340_v5, %s2617_s21 }
  0x5b   : > { %269 = vst [vmem:[#allocation2 + $0xc8] sm:$0xff] %v2616_v0  ;;  %270 = vst [vmem:[#allocation2 + $0x40] sm:$0xff] %v2616_v0 }
  0x5c   : > { %271 = vst [vmem:[#allocation2 + $0x1f8] sm:$0xff] %v2616_v0  ;;  %272 = vst [vmem:[#allocation2 + $0x20] sm:$0xff] %v2616_v0 }
  0x5d   : > { %273 = vst [vmem:[#allocation2 + $0x128] sm:$0xff] %v2616_v0  ;;  %274 = vst [vmem:[#allocation2 + $0x1a0] sm:$0xff] %v2616_v0 }
  0x5e   : > { %275 = vst [vmem:[#allocation2 + $0x1f0] sm:$0xff] %v2616_v0  ;;  %276 = vst [vmem:[#allocation2 + $0xe8] sm:$0xff] %v2616_v0  ;;  %401 = vrot.lane.b32.xlu1 %v2068_v3, %s2618_s23  ;;  %354 = vrot.lane.b32.xlu0 %v2067_v2, %s2617_s21 }
  0x5f   : > { %277 = vst [vmem:[#allocation2 + $0x78] sm:$0xff] %v2616_v0  ;;  %278 = vst [vmem:[#allocation2 + $0x70] sm:$0xff] %v2616_v0 }
  0x60   : > { %279 = vst [vmem:[#allocation2 + $0x90] sm:$0xff] %v2616_v0  ;;  %280 = vst [vmem:[#allocation2 + $0x1d8] sm:$0xff] %v2616_v0 }
  0x61   : > { %281 = vst [vmem:[#allocation2 + $0xd0] sm:$0xff] %v2616_v0  ;;  %282 = vst [vmem:[#allocation2 + $0xb8] sm:$0xff] %v2616_v0 }
  0x62   : > { %283 = vst [vmem:[#allocation2 + $0x88] sm:$0xff] %v2616_v0  ;;  %284 = vst [vmem:[#allocation2 + $0xa8] sm:$0xff] %v2616_v0  ;;  %391 = vrot.lane.b32.xlu1 %v2068_v3, %s2617_s21  ;;  %393 = vrot.lane.b32.xlu0 %v377_v6, %s2617_s21 }
  0x63   : > { %285 = vst [vmem:[#allocation2 + $0x1c8] sm:$0xff] %v2616_v0  ;;  %286 = vst [vmem:[#allocation2 + $0x170] sm:$0xff] %v2616_v0 }
  0x64   : > { %287 = vst [vmem:[#allocation2 + $0x178] sm:$0xff] %v2616_v0  ;;  %288 = vst [vmem:[#allocation2 + $0x68] sm:$0xff] %v2616_v0 }
  0x65   : > { %289 = vst [vmem:[#allocation2 + $0x190] sm:$0xff] %v2616_v0  ;;  %290 = vst [vmem:[#allocation2 + $0x198] sm:$0xff] %v2616_v0 }
  0x66   : > { %291 = vst [vmem:[#allocation2 + $0x38] sm:$0xff] %v2616_v0  ;;  %292 = vst [vmem:[#allocation2 + $0xc0] sm:$0xff] %v2616_v0  ;;  %343 = vrot.lane.b32.xlu1 %v340_v5, %s2619_s5  ;;  %341 = vrot.lane.b32.xlu0 %v2067_v2, %s2619_s5 }
  0x67   : > { %293 = vst [vmem:[#allocation2 + $0x1c0] sm:$0xff] %v2616_v0  ;;  %294 = vst [vmem:[#allocation2 + $0x158] sm:$0xff] %v2616_v0 }
  0x68   : > { %295 = vst [vmem:[#allocation2 + $0x10] sm:$0xff] %v2616_v0  ;;  %296 = vst [vmem:[#allocation2 + $0x58] sm:$0xff] %v2616_v0 }
  0x69   : > { %297 = vst [vmem:[#allocation2 + $0xa0] sm:$0xff] %v2616_v0  ;;  %313 = vst [vmem:[#allocation2 + $0xe0] sm:$0xf] %v298_v1 }
  0x6a   : > { %352 = vst [vmem:[#allocation2 + $0x138] sm:$0xf] %v2067_v2  ;;  %389 = vst [vmem:[#allocation2 + $0x80] sm:$0xf] %v2068_v3  ;;  %380 = vrot.lane.b32.xlu1 %v377_v6, %s2619_s5  ;;  %378 = vrot.lane.b32.xlu0 %v2068_v3, %s2619_s5 }
  0x6b   : > { %426 = vst [vmem:[#allocation2 + $0x1b8] sm:$0xf] %v2069_v7  ;;  %463 = vst [vmem:[#allocation2 + $0x1e8] sm:$0xf] %v2070_v8 }
  0x6c   : > { %314 = vst [vmem:[#allocation2 + $0x188] sm:$0xf] %v300_v4  ;;  %353 = vst [vmem:[#allocation2 + $0x140] sm:$0xf] %v340_v5 }
  0x6d   : > { %390 = vst [vmem:[#allocation2 + $0x1a8] sm:$0xf] %v377_v6  ;;  %500 = vst [vmem:[#allocation2 + $0x160] sm:$0xf] %v2071_v11 }
  0x6e   : > { %537 = vst [vmem:[#allocation2 + $0x1e0] sm:$0xf] %v2072_v12  ;;  %574 = vst [vmem:[#allocation2 + $0xf0] sm:$0xf] %v2073_v13  ;;  %438 = vrot.lane.b32.xlu1 %v2069_v7, %s2618_s23  ;;  %440 = vrot.lane.b32.xlu0 %v414_v9, %s2618_s23 }
  0x6f   : > { %427 = vst [vmem:[#allocation2 + $0x28] sm:$0xf] %v414_v9  ;;  %464 = vst [vmem:[#allocation2 + $0xf8] sm:$0xf] %v451_v10 }
  0x70   : > { %501 = vst [vmem:[#allocation2 + $0x30] sm:$0xf] %v488_v14  ;;  %538 = vst [vmem:[#allocation2] sm:$0xf] %v525_v15  ;;  %v613_v44 = vld [vmem:[#allocation2 + $0xe0] sm:$0xff] }
  0x71   : > { %575 = vst [vmem:[#allocation2 + $0x8] sm:$0xf] %v562_v16  ;;  %v615_v2 = vld [vmem:[#allocation2 + $0x138] sm:$0xff] }
  0x72   : > { %477 = vrot.lane.b32.xlu1 %v451_v10, %s2618_s23  ;;  %430 = vrot.lane.b32.xlu0 %v414_v9, %s2617_s21 }
  0x73   : > { %v614_v40 = vld [vmem:[#allocation2 + $0x188] sm:$0xff]  ;;  %v616_v60 = vld [vmem:[#allocation2 + $0x140] sm:$0xff] }
  0x76   : > { %475 = vrot.lane.b32.xlu1 %v2070_v8, %s2618_s23  ;;  %428 = vrot.lane.b32.xlu0 %v2069_v7, %s2617_s21 }
  0x7a   : > { %465 = vrot.lane.b32.xlu1 %v2070_v8, %s2617_s21  ;;  %467 = vrot.lane.b32.xlu0 %v451_v10, %s2617_s21 }
  0x7e   : > { %417 = vrot.lane.b32.xlu1 %v414_v9, %s2619_s5  ;;  %415 = vrot.lane.b32.xlu0 %v2069_v7, %s2619_s5  ;;  %v618_v9 = vld [vmem:[#allocation2 + $0x1a8] sm:$0xff] }
  0x82   : > { %454 = vrot.lane.b32.xlu1 %v451_v10, %s2619_s5  ;;  %452 = vrot.lane.b32.xlu0 %v2070_v8, %s2619_s5  ;;  %v617_v10 = vld [vmem:[#allocation2 + $0x80] sm:$0xff] }
  0x86   : > { %512 = vrot.lane.b32.xlu1 %v2071_v11, %s2618_s23  ;;  %514 = vrot.lane.b32.xlu0 %v488_v14, %s2618_s23 }
  0x8a   : > { %551 = vrot.lane.b32.xlu1 %v525_v15, %s2618_s23  ;;  %504 = vrot.lane.b32.xlu0 %v488_v14, %s2617_s21 }
  0x8e   : > { %549 = vrot.lane.b32.xlu1 %v2072_v12, %s2618_s23  ;;  %502 = vrot.lane.b32.xlu0 %v2071_v11, %s2617_s21 }
  0x92   : > { %539 = vrot.lane.b32.xlu1 %v2072_v12, %s2617_s21  ;;  %541 = vrot.lane.b32.xlu0 %v525_v15, %s2617_s21 }
  0x96   : > { %491 = vrot.lane.b32.xlu1 %v488_v14, %s2619_s5  ;;  %489 = vrot.lane.b32.xlu0 %v2071_v11, %s2619_s5 }
  0x9a   : > { %528 = vrot.lane.b32.xlu1 %v525_v15, %s2619_s5  ;;  %526 = vrot.lane.b32.xlu0 %v2072_v12, %s2619_s5 }
  0x9e   : > { %586 = vrot.lane.b32.xlu1 %v2073_v13, %s2618_s23  ;;  %588 = vrot.lane.b32.xlu0 %v562_v16, %s2618_s23 }
  0xa2   : > { %576 = vrot.lane.b32.xlu1 %v2073_v13, %s2617_s21  ;;  %578 = vrot.lane.b32.xlu0 %v562_v16, %s2617_s21 }
  0xa6   : > { %565 = vrot.lane.b32.xlu1 %v562_v16, %s2619_s5  ;;  %563 = vrot.lane.b32.xlu0 %v2073_v13, %s2619_s5 }
  0xbc   : > { %v316_v17 = vpop.permute.xlu1 %315  ;;  %v327_v18 = vpop.permute.xlu0 %326 }
  0xc0   : > { %v302_v19 = vpop.permute.xlu0 %301  ;;  %v318_v20 = vpop.permute.xlu1 %317 }
  0xc1   : > { %v309_v21 = vsel %vm305_vm0, 0.0, %v302_v19  ;;  %v320_v22 = vsel %vm319_vm1, %v316_v17, %v318_v20  ;;  %v323_v23 = vsel %vm319_vm1, %v318_v20, 0.0 }
  0xc2   : > { %310 = vst [vmem:[#allocation2 + $0xb0] sm:$0xf] %v309_v21  ;;  %324 = vst [vmem:[#allocation2 + $0x148] sm:$0xf] %v320_v22 }
  0xc3   : > { %325 = vst [vmem:[#allocation2 + $0x1d0] sm:$0xf] %v323_v23 }
  0xc4   : > { %v304_v24 = vpop.permute.xlu1 %303  ;;  %v329_v25 = vpop.permute.xlu0 %328 }
  0xc5   : > { %v306_v26 = vsel %vm305_vm0, %v302_v19, %v304_v24  ;;  %v331_v27 = vsel %vm330_vm2, %v327_v18, %v329_v25  ;;  %v334_v28 = vsel %vm330_vm2, %v329_v25, 0.0 }
  0xc6   : > { %311 = vst [vmem:[#allocation2 + $0x1b0] sm:$0xf] %v306_v26  ;;  %335 = vst [vmem:[#allocation2 + $0xb8] sm:$0xf] %v331_v27 }
  0xc7   : > { %336 = vst [vmem:[#allocation2 + $0x88] sm:$0xf] %v334_v28 }
  0xc8   : > { %v365_v29 = vpop.permute.xlu1 %364  ;;  %v367_v30 = vpop.permute.xlu0 %366 }
  0xc9   : > { %v368_v31 = vsel %vm330_vm2, %v365_v29, %v367_v30  ;;  %v371_v32 = vsel %vm330_vm2, %v367_v30, 0.0  ;;  %v629_v43 = vld [vmem:[#allocation2 + $0x148] sm:$0xff]  ;;  %v597_v52 = vld [vmem:[#allocation2 + $0xb0] sm:$0xff] }
  0xca   : > { %372 = vst [vmem:[#allocation2 + $0xa8] sm:$0xf] %v368_v31  ;;  %373 = vst [vmem:[#allocation2 + $0x1c8] sm:$0xf] %v371_v32  ;;  %v630_v39 = vld [vmem:[#allocation2 + $0x1d0] sm:$0xff] }
  0xcc   : > { %v404_v33 = vpop.permute.xlu1 %403  ;;  %v357_v34 = vpop.permute.xlu0 %356 }
  0xcd   : > { %v408_v35 = vsel %vm330_vm2, %v404_v33, 0.0  ;;  %v361_v36 = vsel %vm319_vm1, %v357_v34, 0.0  ;;  %v645_v38 = vld [vmem:[#allocation2 + $0xb8] sm:$0xff]  ;;  %v598_v49 = vld [vmem:[#allocation2 + $0x1b0] sm:$0xff] }
  0xce   : > { %v646_v37 = vld [vmem:[#allocation2 + $0x88] sm:$0xff]  ;;  %410 = vst [vmem:[#allocation2 + $0x178] sm:$0xf] %v408_v35  ;;  %363 = vst [vmem:[#allocation2 + $0xc8] sm:$0xf] %v361_v36 }
  0xcf   : > { %689 = vmatprep.subr.mxu0 %v646_v37  ;;  %v620_v37 = vld [vmem:[#allocation2 + $0x28] sm:$0xff] }
  0xd0   : > { %690 = vmatpush1.msra.mxu0 %v645_v38  ;;  %v402_v41 = vpop.permute.xlu1 %401  ;;  %v355_v42 = vpop.permute.xlu0 %354 }
  0xd1   : > { %691 = vmatprep.subr.mxu0 %v630_v39  ;;  %v405_v45 = vsel %vm330_vm2, %v402_v41, %v404_v33  ;;  %v358_v46 = vsel %vm319_vm1, %v355_v42, %v357_v34  ;;  %v648_v47 = vld [vmem:[#allocation2 + $0x1c8] sm:$0xff]  ;;  %v619_v42 = vld [vmem:[#allocation2 + $0x1b8] sm:$0xff] }
  0xd2   : > { %692 = vmatpush1.msra.mxu0 %v629_v43  ;;  %v647_v48 = vld [vmem:[#allocation2 + $0xa8] sm:$0xff]  ;;  %409 = vst [vmem:[#allocation2 + $0x170] sm:$0xf] %v405_v45  ;;  %362 = vst [vmem:[#allocation2 + $0x100] sm:$0xf] %v358_v46  ;;  %760 = vmatprep.subr.mxu1 %v648_v47 }
  0xd3   : > { %693 = vmatprep.subr.mxu0 %v614_v40  ;;  %761 = vmatpush1.msra.mxu1 %v647_v48 }
  0xd4   : > { %694 = vmatpush1.msra.mxu0 %v613_v44  ;;  %v392_v50 = vpop.permute.xlu1 %391  ;;  %v394_v51 = vpop.permute.xlu0 %393 }
  0xd5   : > { %695 = vmatprep.subr.mxu0 %v598_v49  ;;  %v395_v54 = vsel %vm319_vm1, %v392_v50, %v394_v51  ;;  %v398_v55 = vsel %vm319_vm1, %v394_v51, 0.0  ;;  %v632_v56 = vld [vmem:[#allocation2 + $0xc8] sm:$0xff]  ;;  %v650_v57 = vld [vmem:[#allocation2 + $0x178] sm:$0xff] }
  0xd6   : > { %696 = vmatpush1.msra.mxu0 %v597_v52  ;;  %399 = vst [vmem:[#allocation2 + $0x40] sm:$0xf] %v395_v54  ;;  %400 = vst [vmem:[#allocation2 + $0x1f8] sm:$0xf] %v398_v55  ;;  %762 = vmatprep.subr.mxu1 %v632_v56  ;;  %v622_v49 = vld [vmem:[#allocation2 + $0xf8] sm:$0xff]  ;;  %v621_v50 = vld [vmem:[#allocation2 + $0x1e8] sm:$0xff] }
  0xd7   : > { %831 = vmatprep.subr.mxu0 %v650_v57  ;;  %2074 = vmatmul.mubr.msk.f32.vlgmr.msra.gmra.mxu0 %vm661_vm3, %v2924_v53 }
  0xd8   : > { %v344_v58 = vpop.permute.xlu1 %343  ;;  %v342_v59 = vpop.permute.xlu0 %341  ;;  %871 = vmatprep.mubr.f32.mxu0 %v2616_v0 }
  0xd9   : > { %v345_v61 = vsel %vm305_vm0, %v342_v59, %v344_v58  ;;  %v348_v62 = vsel %vm305_vm0, 0.0, %v342_v59  ;;  %v631_v63 = vld [vmem:[#allocation2 + $0x100] sm:$0xff]  ;;  %v649_v1 = vld [vmem:[#allocation2 + $0x170] sm:$0xff] }
  0xda   : > { %349 = vst [vmem:[#allocation2 + $0xd8] sm:$0xf] %v348_v62  ;;  %350 = vst [vmem:[#allocation2 + $0x18] sm:$0xf] %v345_v61  ;;  %763 = vmatpush1.msra.mxu1 %v631_v63  ;;  %832 = vmatpush1.msra.mxu0 %v649_v1 }
  0xdb   : > { %764 = vmatprep.subr.mxu1 %v616_v60 }
  0xdc   : > { %v381_v3 = vpop.permute.xlu1 %380  ;;  %v379_v4 = vpop.permute.xlu0 %378  ;;  %765 = vmatpush1.msra.mxu1 %v615_v2 }
  0xdd   : > { %v382_v5 = vsel %vm305_vm0, %v379_v4, %v381_v3  ;;  %v385_v6 = vsel %vm305_vm0, 0.0, %v379_v4  ;;  %v634_v7 = vld [vmem:[#allocation2 + $0x1f8] sm:$0xff]  ;;  %v633_v8 = vld [vmem:[#allocation2 + $0x40] sm:$0xff] }
  0xde   : > { %386 = vst [vmem:[#allocation2 + $0x50] sm:$0xf] %v385_v6  ;;  %387 = vst [vmem:[#allocation2 + $0x168] sm:$0xf] %v382_v5  ;;  %833 = vmatprep.subr.mxu0 %v634_v7 }
  0xdf   : > { %834 = vmatpush1.msra.mxu0 %v633_v8 }
  0xe0   : > { %v439_v11 = vpop.permute.xlu1 %438  ;;  %v441_v12 = vpop.permute.xlu0 %440  ;;  %835 = vmatprep.subr.mxu0 %v618_v9 }
  0xe1   : > { %v442_v13 = vsel %vm330_vm2, %v439_v11, %v441_v12  ;;  %v445_v14 = vsel %vm330_vm2, %v441_v12, 0.0  ;;  %v600_v15 = vld [vmem:[#allocation2 + $0x18] sm:$0xff]  ;;  %836 = vmatpush1.msra.mxu0 %v617_v10 }
  0xe2   : > { %v599_v16 = vld [vmem:[#allocation2 + $0xd8] sm:$0xff]  ;;  %446 = vst [vmem:[#allocation2 + $0x68] sm:$0xf] %v442_v13  ;;  %447 = vst [vmem:[#allocation2 + $0x190] sm:$0xf] %v445_v14  ;;  %766 = vmatprep.subr.mxu1 %v600_v15  ;;  %v624_v15 = vld [vmem:[#allocation2 + $0x30] sm:$0xff] }
  0xe3   : > { %767 = vmatpush1.msra.mxu1 %v599_v16 }
  0xe4   : > { %v478_v17 = vpop.permute.xlu1 %477  ;;  %v431_v18 = vpop.permute.xlu0 %430  ;;  %2075 = vmatmul.mubr.msk.f32.vlgmr.msra.gmra.mxu1 %vm661_vm3, %v2924_v53 }
  0xe5   : > { %v482_v19 = vsel %vm330_vm2, %v478_v17, 0.0  ;;  %v435_v20 = vsel %vm319_vm1, %v431_v18, 0.0  ;;  %v602_v21 = vld [vmem:[#allocation2 + $0x168] sm:$0xff]  ;;  %v601_v22 = vld [vmem:[#allocation2 + $0x50] sm:$0xff]  ;;  %942 = vmatprep.mubr.f32.mxu1 %v2616_v0 }
  0xe6   : > { %484 = vst [vmem:[#allocation2 + $0x38] sm:$0xf] %v482_v19  ;;  %437 = vst [vmem:[#allocation2 + $0x128] sm:$0xf] %v435_v20  ;;  %837 = vmatprep.subr.mxu0 %v602_v21  ;;  %v623_v19 = vld [vmem:[#allocation2 + $0x160] sm:$0xff] }
  0xe7   : > { %838 = vmatpush1.msra.mxu0 %v601_v22 }
  0xe8   : > { %v476_v23 = vpop.permute.xlu1 %475  ;;  %v429_v24 = vpop.permute.xlu0 %428  ;;  %2076 = vmatmul.mubr.msk.f32.vlgmr.msra.gmra.mxu0 %vm661_vm3, %v2924_v53 }
  0xe9   : > { %v479_v25 = vsel %vm330_vm2, %v476_v23, %v478_v17  ;;  %v432_v26 = vsel %vm319_vm1, %v429_v24, %v431_v18  ;;  %v652_v27 = vld [vmem:[#allocation2 + $0x190] sm:$0xff]  ;;  %v651_v28 = vld [vmem:[#allocation2 + $0x68] sm:$0xff]  ;;  %1013 = vmatprep.mubr.f32.mxu0 %v2616_v0 }
  0xea   : > { %483 = vst [vmem:[#allocation2 + $0x198] sm:$0xf] %v479_v25  ;;  %436 = vst [vmem:[#allocation2 + $0x20] sm:$0xf] %v432_v26  ;;  %902 = vmatprep.subr.mxu1 %v652_v27  ;;  %v626_v27 = vld [vmem:[#allocation2] sm:$0xff] }
  0xeb   : > { %903 = vmatpush1.msra.mxu1 %v651_v28  ;;  %v625_v28 = vld [vmem:[#allocation2 + $0x1e0] sm:$0xff] }
  0xec   : > { %v466_v29 = vpop.permute.xlu1 %465  ;;  %v468_v30 = vpop.permute.xlu0 %467 }
  0xed   : > { %v469_v31 = vsel %vm319_vm1, %v466_v29, %v468_v30  ;;  %v472_v32 = vsel %vm319_vm1, %v468_v30, 0.0  ;;  %v636_v33 = vld [vmem:[#allocation2 + $0x128] sm:$0xff]  ;;  %v654_v34 = vld [vmem:[#allocation2 + $0x38] sm:$0xff] }
  0xee   : > { %473 = vst [vmem:[#allocation2 + $0x1a0] sm:$0xf] %v469_v31  ;;  %474 = vst [vmem:[#allocation2 + $0x1f0] sm:$0xf] %v472_v32  ;;  %904 = vmatprep.subr.mxu1 %v636_v33  ;;  %973 = vmatprep.subr.mxu0 %v654_v34 }
  0xf0   : > { %v418_v35 = vpop.permute.xlu1 %417  ;;  %v416_v36 = vpop.permute.xlu0 %415 }
  0xf1   : > { %v419_v38 = vsel %vm305_vm0, %v416_v36, %v418_v35  ;;  %v422_v39 = vsel %vm305_vm0, 0.0, %v416_v36  ;;  %v635_v40 = vld [vmem:[#allocation2 + $0x20] sm:$0xff]  ;;  %v653_v41 = vld [vmem:[#allocation2 + $0x198] sm:$0xff] }
  0xf2   : > { %423 = vst [vmem:[#allocation2 + $0x130] sm:$0xf] %v422_v39  ;;  %424 = vst [vmem:[#allocation2 + $0x48] sm:$0xf] %v419_v38  ;;  %905 = vmatpush1.msra.mxu1 %v635_v40  ;;  %974 = vmatpush1.msra.mxu0 %v653_v41 }
  0xf3   : > { %906 = vmatprep.subr.mxu1 %v620_v37 }
  0xf4   : > { %v455_v43 = vpop.permute.xlu1 %454  ;;  %v453_v44 = vpop.permute.xlu0 %452  ;;  %907 = vmatpush1.msra.mxu1 %v619_v42 }
  0xf5   : > { %v456_v45 = vsel %vm305_vm0, %v453_v44, %v455_v43  ;;  %v459_v46 = vsel %vm305_vm0, 0.0, %v453_v44  ;;  %v638_v47 = vld [vmem:[#allocation2 + $0x1f0] sm:$0xff]  ;;  %v637_v48 = vld [vmem:[#allocation2 + $0x1a0] sm:$0xff] }
  0xf6   : > { %460 = vst [vmem:[#allocation2 + $0x180] sm:$0xf] %v459_v46  ;;  %461 = vst [vmem:[#allocation2 + $0x110] sm:$0xf] %v456_v45  ;;  %975 = vmatprep.subr.mxu0 %v638_v47 }
  0xf7   : > { %976 = vmatpush1.msra.mxu0 %v637_v48  ;;  %v628_v48 = vld [vmem:[#allocation2 + $0x8] sm:$0xff] }
  0xf8   : > { %v513_v51 = vpop.permute.xlu1 %512  ;;  %v515_v52 = vpop.permute.xlu0 %514  ;;  %977 = vmatprep.subr.mxu0 %v622_v49  ;;  %v627_v49 = vld [vmem:[#allocation2 + $0xf0] sm:$0xff] }
  0xf9   : > { %v516_v54 = vsel %vm330_vm2, %v513_v51, %v515_v52  ;;  %v519_v55 = vsel %vm330_vm2, %v515_v52, 0.0  ;;  %v604_v56 = vld [vmem:[#allocation2 + $0x48] sm:$0xff]  ;;  %v603_v57 = vld [vmem:[#allocation2 + $0x130] sm:$0xff]  ;;  %978 = vmatpush1.msra.mxu0 %v621_v50  ;;  %v2984_v52 = vld [vmem:[#allocation6 + $0xf8] sm:$0xff] }
  0xfa   : > { %520 = vst [vmem:[#allocation2 + $0xc0] sm:$0xf] %v516_v54  ;;  %521 = vst [vmem:[#allocation2 + $0x1c0] sm:$0xf] %v519_v55  ;;  %908 = vmatprep.subr.mxu1 %v604_v56  ;;  %v2986_v54 = vld [vmem:[#allocation6 + $0x78] sm:$0xff]  ;;  %v2988_v55 = vld [vmem:[#allocation6 + $0xf0] sm:$0xff] }
  0xfb   : > { %909 = vmatpush1.msra.mxu1 %v603_v57  ;;  %v2991_v56 = vld [vmem:[#allocation6 + $0x70] sm:$0xff]  ;;  %v2995_v57 = vld [vmem:[#allocation6 + $0xe8] sm:$0xff] }
  0xfc   : > { %v552_v58 = vpop.permute.xlu1 %551  ;;  %v505_v59 = vpop.permute.xlu0 %504  ;;  %2077 = vmatmul.mubr.msk.f32.vlgmr.msra.gmra.mxu1 %vm661_vm3, %v2924_v53 }
  0xfd   : > { %v556_v60 = vsel %vm330_vm2, %v552_v58, 0.0  ;;  %v509_v61 = vsel %vm319_vm1, %v505_v59, 0.0  ;;  %v606_v62 = vld [vmem:[#allocation2 + $0x110] sm:$0xff]  ;;  %v605_v63 = vld [vmem:[#allocation2 + $0x180] sm:$0xff]  ;;  %1084 = vmatprep.mubr.f32.mxu1 %v2616_v0 }
  0xfe   : > { %558 = vst [vmem:[#allocation2 + $0x10] sm:$0xf] %v556_v60  ;;  %511 = vst [vmem:[#allocation2 + $0x78] sm:$0xf] %v509_v61  ;;  %979 = vmatprep.subr.mxu0 %v606_v62  ;;  %v3011_v60 = vld [vmem:[#allocation6 + $0xd8] sm:$0xff]  ;;  %v3019_v62 = vld [vmem:[#allocation6 + $0xd0] sm:$0xff] }
  0xff   : > { %980 = vmatpush1.msra.mxu0 %v605_v63  ;;  %v3015_v61 = vld [vmem:[#allocation6 + $0x58] sm:$0xff]  ;;  %v3023_v63 = vld [vmem:[#allocation6 + $0x50] sm:$0xff] }
 0x100   : > { %v550_v1 = vpop.permute.xlu1 %549  ;;  %v503_v2 = vpop.permute.xlu0 %502  ;;  %2078 = vmatmul.mubr.msk.f32.vlgmr.msra.gmra.mxu0 %vm661_vm3, %v2924_v53 }
 0x101   : > { %v553_v3 = vsel %vm330_vm2, %v550_v1, %v552_v58  ;;  %v506_v4 = vsel %vm319_vm1, %v503_v2, %v505_v59  ;;  %v656_v5 = vld [vmem:[#allocation2 + $0x1c0] sm:$0xff]  ;;  %1155 = vmatprep.mubr.f32.mxu0 %v2616_v0  ;;  %v3027_v1 = vld [vmem:[#allocation6 + $0xc8] sm:$0xff] }
 0x102   : > { %v655_v6 = vld [vmem:[#allocation2 + $0xc0] sm:$0xff]  ;;  %557 = vst [vmem:[#allocation2 + $0x158] sm:$0xf] %v553_v3  ;;  %510 = vst [vmem:[#allocation2 + $0xe8] sm:$0xf] %v506_v4  ;;  %1044 = vmatprep.subr.mxu1 %v656_v5  ;;  %v3031_v2 = vld [vmem:[#allocation6 + $0x48] sm:$0xff] }
 0x103   : > { %1045 = vmatpush1.msra.mxu1 %v655_v6  ;;  %v3003_v58 = vld [vmem:[#allocation6 + $0xe0] sm:$0xff]  ;;  %v3043_v5 = vld [vmem:[#allocation6 + $0xb8] sm:$0xff] }
 0x104   : > { %v540_v7 = vpop.permute.xlu1 %539  ;;  %v542_v8 = vpop.permute.xlu0 %541  ;;  %v3007_v59 = vld [vmem:[#allocation6 + $0x60] sm:$0xff]  ;;  %v3047_v6 = vld [vmem:[#allocation6 + $0x38] sm:$0xff] }
 0x105   : > { %v543_v9 = vsel %vm319_vm1, %v540_v7, %v542_v8  ;;  %v546_v10 = vsel %vm319_vm1, %v542_v8, 0.0  ;;  %v640_v11 = vld [vmem:[#allocation2 + $0x78] sm:$0xff]  ;;  %v658_v12 = vld [vmem:[#allocation2 + $0x10] sm:$0xff]  ;;  %v3035_v3 = vld [vmem:[#allocation6 + $0xc0] sm:$0xff] }
 0x106   : > { %547 = vst [vmem:[#allocation2 + $0x70] sm:$0xf] %v543_v9  ;;  %548 = vst [vmem:[#allocation2 + $0x90] sm:$0xf] %v546_v10  ;;  %1046 = vmatprep.subr.mxu1 %v640_v11  ;;  %1115 = vmatprep.subr.mxu0 %v658_v12  ;;  %v3039_v4 = vld [vmem:[#allocation6 + $0x40] sm:$0xff]  ;;  %v3051_v7 = vld [vmem:[#allocation6 + $0xb0] sm:$0xff] }
 0x107   : > { %v3055_v8 = vld [vmem:[#allocation6 + $0x30] sm:$0xff]  ;;  %v3059_v9 = vld [vmem:[#allocation6 + $0xa8] sm:$0xff]  ;;  %v3067_v11 = vld [vmem:[#allocation6 + $0xa0] sm:$0xff] }
 0x108   : > { %v492_v13 = vpop.permute.xlu1 %491  ;;  %v490_v14 = vpop.permute.xlu0 %489  ;;  %v3063_v10 = vld [vmem:[#allocation6 + $0x28] sm:$0xff]  ;;  %v3071_v12 = vld [vmem:[#allocation6 + $0x20] sm:$0xff] }
 0x109   : > { %v493_v16 = vsel %vm305_vm0, %v490_v14, %v492_v13  ;;  %v496_v17 = vsel %vm305_vm0, 0.0, %v490_v14  ;;  %v639_v18 = vld [vmem:[#allocation2 + $0xe8] sm:$0xff]  ;;  %v657_v20 = vld [vmem:[#allocation2 + $0x158] sm:$0xff] }
 0x10a   : > { %497 = vst [vmem:[#allocation2 + $0x118] sm:$0xf] %v496_v17  ;;  %498 = vst [vmem:[#allocation2 + $0x98] sm:$0xf] %v493_v16  ;;  %1047 = vmatpush1.msra.mxu1 %v639_v18  ;;  %1116 = vmatpush1.msra.mxu0 %v657_v20  ;;  %v3075_v13 = vld [vmem:[#allocation6 + $0x98] sm:$0xff]  ;;  %v3091_v16 = vld [vmem:[#allocation6 + $0x10] sm:$0xff] }
 0x10b   : > { %1048 = vmatprep.subr.mxu1 %v624_v15  ;;  %v3079_v14 = vld [vmem:[#allocation6 + $0x18] sm:$0xff]  ;;  %v3088_v15 = vld [vmem:[#allocation6 + $0x90] sm:$0xff]  ;;  %v3093_v17 = vld [vmem:[#allocation6 + $0x88] sm:$0xff] }
 0x10c   : > { %v529_v21 = vpop.permute.xlu1 %528  ;;  %v527_v22 = vpop.permute.xlu0 %526  ;;  %1049 = vmatpush1.msra.mxu1 %v623_v19  ;;  %v3095_v18 = vld [vmem:[#allocation6 + $0x8] sm:$0xff]  ;;  %v3103_v19 = vld [vmem:[#allocation6 + $0x80] sm:$0xff] }
 0x10d   : > { %v530_v23 = vsel %vm305_vm0, %v527_v22, %v529_v21  ;;  %v533_v24 = vsel %vm305_vm0, 0.0, %v527_v22  ;;  %v642_v25 = vld [vmem:[#allocation2 + $0x90] sm:$0xff]  ;;  %v3107_v20 = vld [vmem:[#allocation6] sm:$0xff] }
 0x10e   : > { %v641_v26 = vld [vmem:[#allocation2 + $0x70] sm:$0xff]  ;;  %534 = vst [vmem:[#allocation2 + $0x120] sm:$0xf] %v533_v24  ;;  %535 = vst [vmem:[#allocation2 + $0x150] sm:$0xf] %v530_v23  ;;  %1117 = vmatprep.subr.mxu0 %v642_v25 }
 0x10f   : > { %1118 = vmatpush1.msra.mxu0 %v641_v26 }
 0x110   : > { %v587_v29 = vpop.permute.xlu1 %586  ;;  %v589_v30 = vpop.permute.xlu0 %588  ;;  %1119 = vmatprep.subr.mxu0 %v626_v27 }
 0x111   : > { %v590_v31 = vsel %vm330_vm2, %v587_v29, %v589_v30  ;;  %v593_v32 = vsel %vm330_vm2, %v589_v30, 0.0  ;;  %v608_v33 = vld [vmem:[#allocation2 + $0x98] sm:$0xff]  ;;  %1120 = vmatpush1.msra.mxu0 %v625_v28 }
 0x112   : > { %v607_v34 = vld [vmem:[#allocation2 + $0x118] sm:$0xff]  ;;  %594 = vst [vmem:[#allocation2 + $0x58] sm:$0xf] %v590_v31  ;;  %595 = vst [vmem:[#allocation2 + $0xa0] sm:$0xf] %v593_v32  ;;  %1050 = vmatprep.subr.mxu1 %v608_v33 }
 0x113   : > { %1051 = vmatpush1.msra.mxu1 %v607_v34 }
 0x114   : > { %v577_v35 = vpop.permute.xlu1 %576  ;;  %v579_v36 = vpop.permute.xlu0 %578  ;;  %2079 = vmatmul.mubr.msk.f32.vlgmr.msra.gmra.mxu1 %vm661_vm3, %v2924_v53 }
 0x115   : > { %v580_v37 = vsel %vm319_vm1, %v577_v35, %v579_v36  ;;  %v583_v38 = vsel %vm319_vm1, %v579_v36, 0.0  ;;  %v610_v39 = vld [vmem:[#allocation2 + $0x150] sm:$0xff]  ;;  %v609_v40 = vld [vmem:[#allocation2 + $0x120] sm:$0xff]  ;;  %1226 = vmatprep.mubr.f32.mxu1 %v2616_v0 }
 0x116   : > { %584 = vst [vmem:[#allocation2 + $0x1d8] sm:$0xf] %v580_v37  ;;  %585 = vst [vmem:[#allocation2 + $0xd0] sm:$0xf] %v583_v38  ;;  %1121 = vmatprep.subr.mxu0 %v610_v39 }
 0x117   : > { %1122 = vmatpush1.msra.mxu0 %v609_v40 }
 0x118   : > { %v566_v41 = vpop.permute.xlu1 %565  ;;  %v564_v42 = vpop.permute.xlu0 %563  ;;  %2080 = vmatmul.mubr.msk.f32.vlgmr.msra.gmra.mxu0 %vm661_vm3, %v2924_v53  ;;  %2097 = vmatprep.subr.mxu0 %v2984_v52 }
 0x119   : > { %v567_v43 = vsel %vm305_vm0, %v564_v42, %v566_v41  ;;  %v570_v44 = vsel %vm305_vm0, 0.0, %v564_v42  ;;  %v660_v45 = vld [vmem:[#allocation2 + $0xa0] sm:$0xff]  ;;  %v659_v46 = vld [vmem:[#allocation2 + $0x58] sm:$0xff]  ;;  %2098 = vmatpush3.msra.mxu0 %v2986_v54 }
 0x11a   : > { %571 = vst [vmem:[#allocation2 + $0x108] sm:$0xf] %v570_v44  ;;  %572 = vst [vmem:[#allocation2 + $0x60] sm:$0xf] %v567_v43  ;;  %1186 = vmatprep.subr.mxu1 %v660_v45  ;;  %2099 = vmatprep.subr.mxu0 %v2988_v55  ;;  %v2620_v44 = vmov 0   ;;  %v1361_v45 = vld [vmem:[%s3492_s2] sm:$0xff] }
 0x11b   : > { %1187 = vmatpush1.msra.mxu1 %v659_v46  ;;  %2100 = vmatpush3.msra.mxu0 %v2991_v56 }
 0x11c   : > { %2101 = vmatprep.subr.mxu0 %v2995_v57  ;;  %2478 = vset.pattern.permute.xlu1 %v2620_v44 }
 0x11d   : > { %v644_v0 = vld [vmem:[#allocation2 + $0xd0] sm:$0xff]  ;;  %v643_v47 = vld [vmem:[#allocation2 + $0x1d8] sm:$0xff]  ;;  %2479 = vset.pattern.permute.xlu0 %v2620_v44 }
 0x11e   : > { %1188 = vmatprep.subr.mxu1 %v644_v0 }
 0x11f   : > { %1189 = vmatpush1.msra.mxu1 %v643_v47 }
 0x120   : > { %1190 = vmatprep.subr.mxu1 %v628_v48 }
 0x121   : > { %1191 = vmatpush1.msra.mxu1 %v627_v49  ;;  %v612_v50 = vld [vmem:[#allocation2 + $0x60] sm:$0xff]  ;;  %v611_v51 = vld [vmem:[#allocation2 + $0x108] sm:$0xff] }
 0x122   : > { %1192 = vmatprep.subr.mxu1 %v612_v50 }
 0x123   : > { %1193 = vmatpush1.msra.mxu1 %v611_v51 }
 0x124   : > { %2081 = vmatmul.mubr.msk.f32.vlgmr.msra.gmra.mxu1 %vm661_vm3, %v2924_v53  ;;  %2132 = vmatprep.subr.mxu1 %v2984_v52  ;;  %v2999_v53 = vld [vmem:[#allocation6 + $0x68] sm:$0xff] }
 0x125   : > { %2133 = vmatpush3.msra.mxu1 %v2986_v54  ;;  %2102 = vmatpush3.msra.mxu0 %v2999_v53 }
 0x126   : > { %2134 = vmatprep.subr.mxu1 %v2988_v55  ;;  %2103 = vmatprep.subr.mxu0 %v3003_v58 }
 0x127   : > { %2135 = vmatpush3.msra.mxu1 %v2991_v56  ;;  %2104 = vmatpush3.msra.mxu0 %v3007_v59 }
 0x128   : > { %2136 = vmatprep.subr.mxu1 %v2995_v57  ;;  %2105 = vmatprep.subr.mxu0 %v3011_v60 }
 0x129   : > { %2137 = vmatpush3.msra.mxu1 %v2999_v53  ;;  %2106 = vmatpush3.msra.mxu0 %v3015_v61 }
 0x12a   : > { %2138 = vmatprep.subr.mxu1 %v3003_v58  ;;  %2107 = vmatprep.subr.mxu0 %v3019_v62 }
 0x12b   : > { %2139 = vmatpush3.msra.mxu1 %v3007_v59  ;;  %2108 = vmatpush3.msra.mxu0 %v3023_v63 }
 0x12c   : > { %2140 = vmatprep.subr.mxu1 %v3011_v60  ;;  %2109 = vmatprep.subr.mxu0 %v3027_v1 }
 0x12d   : > { %2141 = vmatpush3.msra.mxu1 %v3015_v61  ;;  %2110 = vmatpush3.msra.mxu0 %v3031_v2 }
 0x12e   : > { %2142 = vmatprep.subr.mxu1 %v3019_v62  ;;  %2111 = vmatprep.subr.mxu0 %v3035_v3 }
 0x12f   : > { %2143 = vmatpush3.msra.mxu1 %v3023_v63  ;;  %2112 = vmatpush3.msra.mxu0 %v3039_v4 }
 0x130   : > { %2144 = vmatprep.subr.mxu1 %v3027_v1  ;;  %2113 = vmatprep.subr.mxu0 %v3043_v5 }
 0x131   : > { %2145 = vmatpush3.msra.mxu1 %v3031_v2  ;;  %2114 = vmatpush3.msra.mxu0 %v3047_v6 }
 0x132   : > { %2146 = vmatprep.subr.mxu1 %v3035_v3  ;;  %2115 = vmatprep.subr.mxu0 %v3051_v7 }
 0x133   : > { %2147 = vmatpush3.msra.mxu1 %v3039_v4  ;;  %2116 = vmatpush3.msra.mxu0 %v3055_v8 }
 0x134   : > { %2148 = vmatprep.subr.mxu1 %v3043_v5  ;;  %2117 = vmatprep.subr.mxu0 %v3059_v9 }
 0x135   : > { %2149 = vmatpush3.msra.mxu1 %v3047_v6  ;;  %2118 = vmatpush3.msra.mxu0 %v3063_v10 }
 0x136   : > { %2150 = vmatprep.subr.mxu1 %v3051_v7  ;;  %2119 = vmatprep.subr.mxu0 %v3067_v11 }
 0x137   : > { %2151 = vmatpush3.msra.mxu1 %v3055_v8  ;;  %2120 = vmatpush3.msra.mxu0 %v3071_v12 }
 0x138   : > { %2152 = vmatprep.subr.mxu1 %v3059_v9  ;;  %2121 = vmatprep.subr.mxu0 %v3075_v13 }
 0x139   : > { %2153 = vmatpush3.msra.mxu1 %v3063_v10  ;;  %2122 = vmatpush3.msra.mxu0 %v3079_v14 }
 0x13a   : > { %2154 = vmatprep.subr.mxu1 %v3067_v11  ;;  %2123 = vmatprep.subr.mxu0 %v3088_v15 }
 0x13b   : > { %2155 = vmatpush3.msra.mxu1 %v3071_v12  ;;  %2124 = vmatpush3.msra.mxu0 %v3091_v16 }
 0x13c   : > { %2156 = vmatprep.subr.mxu1 %v3075_v13  ;;  %2125 = vmatprep.subr.mxu0 %v3093_v17 }
 0x13d   : > { %2157 = vmatpush3.msra.mxu1 %v3079_v14  ;;  %2126 = vmatpush3.msra.mxu0 %v3095_v18 }
 0x13e   : > { %2158 = vmatprep.subr.mxu1 %v3088_v15  ;;  %2127 = vmatprep.subr.mxu0 %v3103_v19 }
 0x13f   : > { %2159 = vmatpush3.msra.mxu1 %v3091_v16  ;;  %2128 = vmatpush3.msra.mxu0 %v3107_v20 }
 0x140   : > { %2160 = vmatprep.subr.mxu1 %v3093_v17  ;;  %2167 = vmatprep.subr.mxu0 %v2984_v52 }
 0x141   : > { %2161 = vmatpush3.msra.mxu1 %v3095_v18 }
 0x142   : > { %2162 = vmatprep.subr.mxu1 %v3103_v19 }
 0x143   : > { %2163 = vmatpush3.msra.mxu1 %v3107_v20 }
 0x144   : > { %2202 = vmatprep.subr.mxu1 %v2984_v52 }
 0x197   : > { %v731_v21 = vpop.f32.mrf.mxu0 }
 0x199   : > { %v733_v22 = vpop.f32.mrf.mxu0 }
 0x1a4   : > { %v802_v23 = vpop.f32.mrf.mxu1 }
 0x1a5   : > { %v2443_v24 = vpack.i.bf16 %v802_v23, %v733_v22 }
 0x1a6   : > { %v804_v25 = vpop.f32.mrf.mxu1 }
 0x1a7   : > { %2444 = vrot.lane.b32.xlu0 %v2443_v24, %s2617_s21 }
 0x1a8   : > { %v3115_v26 = vpop.f32.mrf.mxu0 }
 0x1a9   : > { %v2448_v27 = vpack.i.bf16 %v3115_v26, %v804_v25 }
 0x1aa   : > { %v3120_v28 = vpop.f32.mrf.mxu0 }
 0x1ab   : > { %1249 = vrot.lane.b32.xlu0 %v731_v21, %s2617_s21  ;;  %2449 = vrot.lane.b32.xlu1 %v2448_v27, %s2617_s21 }
 0x1bc   : > { %v3122_v29 = vpop.f32.mrf.mxu1 }
 0x1bd   : > { %v2453_v30 = vpack.i.bf16 %v3122_v29, %v3120_v28 }
 0x1be   : > { %v3126_v31 = vpop.f32.mrf.mxu1 }
 0x1bf   : > { %2454 = vrot.lane.b32.xlu1 %v2453_v30, %s2617_s21 }
 0x1c0   : > { %v3129_v32 = vpop.f32.mrf.mxu0 }
 0x1c1   : > { %v2458_v33 = vpack.i.bf16 %v3129_v32, %v3126_v31 }
 0x1c2   : > { %v3134_v34 = vpop.f32.mrf.mxu0 }
 0x1c3   : > { %2459 = vrot.lane.b32.xlu0 %v2458_v33, %s2617_s21 }
 0x1d4   : > { %v3136_v35 = vpop.f32.mrf.mxu1 }
 0x1d5   : > { %v2463_v36 = vpack.i.bf16 %v3136_v35, %v3134_v34 }
 0x1d6   : > { %v3140_v37 = vpop.f32.mrf.mxu1 }
 0x1d7   : > { %2464 = vrot.lane.b32.xlu1 %v2463_v36, %s2617_s21 }
 0x1d8   : > { %v3143_v38 = vpop.f32.mrf.mxu0 }
 0x1d9   : > { %v2468_v39 = vpack.i.bf16 %v3143_v38, %v3140_v37 }
 0x1da   : > { %v3148_v40 = vpop.f32.mrf.mxu0 }
 0x1db   : > { %2469 = vrot.lane.b32.xlu0 %v2468_v39, %s2617_s21 }
 0x1e4   : > { %v3150_v41 = vpop.f32.mrf.mxu1 }
 0x1e5   : > { %v2473_v42 = vpack.i.bf16 %v3150_v41, %v3148_v40 }
 0x1e6   : > { %v3154_v43 = vpop.f32.mrf.mxu1 }
 0x1e7   : > { %1279 = vrot.lane.b32.xlu0 %v3154_v43, %s2617_s21  ;;  %2474 = vrot.lane.b32.xlu1 %v2473_v42, %s2617_s21  ;;  %s2548_s21 = scalar_lea.vmem %s2547_s28, 2048 }
 0x1e8   : > { %p2550_p12 = scmp.lt.s32.totalorder %s2548_s21, %s2542_s12 }
 0x1ea   : > { %p2551_p13 = por %p2550_p12, %p2549_p10 }
 0x1eb   : > { %1364 = vperm.xlu1 %2478, %v1361_v45  }
 0x1ec   : > { %p2552_p0 = pnand %p2551_p13, %p2545_p9 }
 0x219   : > { %v2445_v46 = vpop.permute.xlu0 %2444 }
 0x21a   : > { %v2447_v0 = vunpack.i.h.bf16 %v2445_v46  ;;  %v2446_v47 = vunpack.i.l.bf16 %v2445_v46 }
 0x21c   : > { %v1282_v48 = vsel %vm319_vm1, %v2446_v47, %v2447_v0 }
 0x21d   : > { %v1250_v49 = vpop.permute.xlu0 %1249  ;;  %v3163_v50 = vpop.permute.xlu1 %2449  ;;  %v1314_v51 = vmax.f32 %v733_v22, %v1282_v48 }
 0x21e   : > { %v1281_v24 = vsel %vm319_vm1, %v1250_v49, %v2446_v47  ;;  %v2452_v27 = vunpack.i.h.bf16 %v3163_v50  ;;  %v2451_v30 = vunpack.i.l.bf16 %v3163_v50 }
 0x21f   : > { %v1313_v33 = vmax.f32 %v731_v21, %v1281_v24  ;;  %1431 = vmatprep.mubr.f32.mxu0 %v1314_v51 }
 0x220   : > { %v1283_v36 = vsel %vm319_vm1, %v2447_v0, %v2451_v30  ;;  %v1284_v39 = vsel %vm319_vm1, %v2451_v30, %v2452_v27 }
 0x221   : > { %v1315_v42 = vmax.f32 %v802_v23, %v1283_v36  ;;  %1432 = vmatmul.mubr.f32.vlgmr.msra.gmra.mxu0 %v1313_v33  ;;  %v1316_v44 = vmax.f32 %v804_v25, %v1284_v39 }
 0x222   : > { %2168 = vmatpush3.msra.mxu0 %v2986_v54 }
 0x223   : > { %2169 = vmatprep.subr.mxu0 %v2988_v55  ;;  %1504 = vmatprep.mubr.f32.mxu1 %v1316_v44 }
 0x224   : > { %2170 = vmatpush3.msra.mxu0 %v2991_v56  ;;  %1505 = vmatmul.mubr.f32.vlgmr.msra.gmra.mxu1 %v1315_v42 }
 0x225   : > { %2171 = vmatprep.subr.mxu0 %v2995_v57  ;;  %2203 = vmatpush3.msra.mxu1 %v2986_v54 }
 0x226   : > { %2172 = vmatpush3.msra.mxu0 %v2999_v53  ;;  %2204 = vmatprep.subr.mxu1 %v2988_v55 }
 0x227   : > { %2173 = vmatprep.subr.mxu0 %v3003_v58  ;;  %2205 = vmatpush3.msra.mxu1 %v2991_v56 }
 0x228   : > { %2174 = vmatpush3.msra.mxu0 %v3007_v59  ;;  %2206 = vmatprep.subr.mxu1 %v2995_v57 }
 0x229   : > { %2175 = vmatprep.subr.mxu0 %v3011_v60  ;;  %2207 = vmatpush3.msra.mxu1 %v2999_v53 }
 0x22a   : > { %2176 = vmatpush3.msra.mxu0 %v3015_v61  ;;  %2208 = vmatprep.subr.mxu1 %v3003_v58 }
 0x22b   : > { %2177 = vmatprep.subr.mxu0 %v3019_v62  ;;  %2209 = vmatpush3.msra.mxu1 %v3007_v59 }
 0x22c   : > { %2178 = vmatpush3.msra.mxu0 %v3023_v63  ;;  %2210 = vmatprep.subr.mxu1 %v3011_v60 }
 0x22d   : > { %2179 = vmatprep.subr.mxu0 %v3027_v1  ;;  %2211 = vmatpush3.msra.mxu1 %v3015_v61 }
 0x22e   : > { %2180 = vmatpush3.msra.mxu0 %v3031_v2  ;;  %2212 = vmatprep.subr.mxu1 %v3019_v62 }
 0x22f   : > { %2181 = vmatprep.subr.mxu0 %v3035_v3  ;;  %2213 = vmatpush3.msra.mxu1 %v3023_v63 }
 0x230   : > { %2182 = vmatpush3.msra.mxu0 %v3039_v4  ;;  %2214 = vmatprep.subr.mxu1 %v3027_v1 }
 0x231   : > { %2183 = vmatprep.subr.mxu0 %v3043_v5  ;;  %2215 = vmatpush3.msra.mxu1 %v3031_v2  ;;  %v2455_v21 = vpop.permute.xlu1 %2454 }
 0x232   : > { %2184 = vmatpush3.msra.mxu0 %v3047_v6  ;;  %2216 = vmatprep.subr.mxu1 %v3035_v3  ;;  %v2457_v22 = vunpack.i.h.bf16 %v2455_v21  ;;  %v2456_v23 = vunpack.i.l.bf16 %v2455_v21 }
 0x233   : > { %2185 = vmatprep.subr.mxu0 %v3051_v7  ;;  %2217 = vmatpush3.msra.mxu1 %v3039_v4 }
 0x234   : > { %2186 = vmatpush3.msra.mxu0 %v3055_v8  ;;  %2218 = vmatprep.subr.mxu1 %v3043_v5  ;;  %v1286_v25 = vsel %vm319_vm1, %v2456_v23, %v2457_v22  ;;  %v1285_v49 = vsel %vm319_vm1, %v2452_v27, %v2456_v23 }
 0x235   : > { %2187 = vmatprep.subr.mxu0 %v3059_v9  ;;  %2219 = vmatpush3.msra.mxu1 %v3047_v6  ;;  %v3210_v45 = vpop.permute.xlu0 %2459  ;;  %v1318_v46 = vmax.f32 %v3120_v28, %v1286_v25 }
 0x236   : > { %2188 = vmatpush3.msra.mxu0 %v3063_v10  ;;  %2220 = vmatprep.subr.mxu1 %v3051_v7  ;;  %v2462_v0 = vunpack.i.h.bf16 %v3210_v45  ;;  %v2461_v47 = vunpack.i.l.bf16 %v3210_v45 }
 0x237   : > { %2189 = vmatprep.subr.mxu0 %v3067_v11  ;;  %2221 = vmatpush3.msra.mxu1 %v3055_v8 }
 0x238   : > { %2190 = vmatpush3.msra.mxu0 %v3071_v12  ;;  %1578 = vmatprep.mubr.f32.mxu0 %v1318_v46  ;;  %v1288_v48 = vsel %vm319_vm1, %v2461_v47, %v2462_v0  ;;  %v1287_v51 = vsel %vm319_vm1, %v2457_v22, %v2461_v47 }
 0x239   : > { %2222 = vmatprep.subr.mxu1 %v3059_v9  ;;  %2191 = vmatprep.subr.mxu0 %v3075_v13  ;;  %v1320_v28 = vmax.f32 %v3126_v31, %v1288_v48  ;;  %v1317_v31 = vmax.f32 %v3115_v26, %v1285_v49  ;;  %v1319_v50 = vmax.f32 %v3122_v29, %v1287_v51 }
 0x23a   : > { %2223 = vmatpush3.msra.mxu1 %v3063_v10  ;;  %2192 = vmatpush3.msra.mxu0 %v3079_v14 }
 0x23b   : > { %2224 = vmatprep.subr.mxu1 %v3067_v11  ;;  %2193 = vmatprep.subr.mxu0 %v3088_v15 }
 0x23c   : > { %2225 = vmatpush3.msra.mxu1 %v3071_v12  ;;  %2194 = vmatpush3.msra.mxu0 %v3091_v16 }
 0x23d   : > { %2226 = vmatprep.subr.mxu1 %v3075_v13  ;;  %1652 = vmatprep.mubr.f32.mxu1 %v1320_v28 }
 0x23e   : > { %2195 = vmatprep.subr.mxu0 %v3093_v17  ;;  %2227 = vmatpush3.msra.mxu1 %v3079_v14 }
 0x23f   : > { %2196 = vmatpush3.msra.mxu0 %v3095_v18  ;;  %2228 = vmatprep.subr.mxu1 %v3088_v15 }
 0x240   : > { %2197 = vmatprep.subr.mxu0 %v3103_v19  ;;  %2229 = vmatpush3.msra.mxu1 %v3091_v16 }
 0x241   : > { %2198 = vmatpush3.msra.mxu0 %v3107_v20  ;;  %2230 = vmatprep.subr.mxu1 %v3093_v17 }
 0x242   : > { %1579 = vmatmul.mubr.f32.vlgmr.msra.gmra.mxu0 %v1317_v31  ;;  %2231 = vmatpush3.msra.mxu1 %v3095_v18 }
 0x243   : > { %2237 = vmatprep.subr.mxu0 %v2984_v52  ;;  %2232 = vmatprep.subr.mxu1 %v3103_v19 }
 0x244   : > { %2238 = vmatpush3.msra.mxu0 %v2986_v54  ;;  %2233 = vmatpush3.msra.mxu1 %v3107_v20 }
 0x245   : > { %2239 = vmatprep.subr.mxu0 %v2988_v55  ;;  %1653 = vmatmul.mubr.f32.vlgmr.msra.gmra.mxu1 %v1319_v50 }
 0x246   : > { %2240 = vmatpush3.msra.mxu0 %v2991_v56  ;;  %2272 = vmatprep.subr.mxu1 %v2984_v52 }
 0x247   : > { %2241 = vmatprep.subr.mxu0 %v2995_v57  ;;  %2273 = vmatpush3.msra.mxu1 %v2986_v54 }
 0x248   : > { %2242 = vmatpush3.msra.mxu0 %v2999_v53  ;;  %2274 = vmatprep.subr.mxu1 %v2988_v55 }
 0x249   : > { %2243 = vmatprep.subr.mxu0 %v3003_v58  ;;  %2275 = vmatpush3.msra.mxu1 %v2991_v56  ;;  %v3261_v26 = vpop.permute.xlu1 %2464 }
 0x24a   : > { %2244 = vmatpush3.msra.mxu0 %v3007_v59  ;;  %2276 = vmatprep.subr.mxu1 %v2995_v57  ;;  %v2467_v29 = vunpack.i.h.bf16 %v3261_v26  ;;  %v2466_v24 = vunpack.i.l.bf16 %v3261_v26 }
 0x24b   : > { %2245 = vmatprep.subr.mxu0 %v3011_v60  ;;  %2277 = vmatpush3.msra.mxu1 %v2999_v53 }
 0x24c   : > { %2246 = vmatpush3.msra.mxu0 %v3015_v61  ;;  %2278 = vmatprep.subr.mxu1 %v3003_v58  ;;  %v1290_v27 = vsel %vm319_vm1, %v2466_v24, %v2467_v29  ;;  %v1289_v22 = vsel %vm319_vm1, %v2462_v0, %v2466_v24 }
 0x24d   : > { %2247 = vmatprep.subr.mxu0 %v3019_v62  ;;  %2279 = vmatpush3.msra.mxu1 %v3007_v59  ;;  %v3276_v30 = vpop.permute.xlu0 %2469  ;;  %v1322_v39 = vmax.f32 %v3134_v34, %v1290_v27  ;;  %v1321_v25 = vmax.f32 %v3129_v32, %v1289_v22 }
 0x24e   : > { %2248 = vmatpush3.msra.mxu0 %v3023_v63  ;;  %2280 = vmatprep.subr.mxu1 %v3011_v60  ;;  %v2472_v33 = vunpack.i.h.bf16 %v3276_v30  ;;  %v2471_v36 = vunpack.i.l.bf16 %v3276_v30 }
 0x24f   : > { %2249 = vmatprep.subr.mxu0 %v3027_v1  ;;  %2281 = vmatpush3.msra.mxu1 %v3015_v61 }
 0x250   : > { %2250 = vmatpush3.msra.mxu0 %v3031_v2  ;;  %2282 = vmatprep.subr.mxu1 %v3019_v62  ;;  %v1292_v42 = vsel %vm319_vm1, %v2471_v36, %v2472_v33  ;;  %v1291_v46 = vsel %vm319_vm1, %v2467_v29, %v2471_v36 }
 0x251   : > { %2251 = vmatprep.subr.mxu0 %v3035_v3  ;;  %2283 = vmatpush3.msra.mxu1 %v3023_v63  ;;  %v1324_v34 = vmax.f32 %v3140_v37, %v1292_v42  ;;  %v1323_v47 = vmax.f32 %v3136_v35, %v1291_v46 }
 0x252   : > { %2252 = vmatpush3.msra.mxu0 %v3039_v4  ;;  %1726 = vmatprep.mubr.f32.mxu0 %v1322_v39 }
 0x253   : > { %2284 = vmatprep.subr.mxu1 %v3027_v1  ;;  %2253 = vmatprep.subr.mxu0 %v3043_v5 }
 0x254   : > { %2285 = vmatpush3.msra.mxu1 %v3031_v2  ;;  %2254 = vmatpush3.msra.mxu0 %v3047_v6 }
 0x255   : > { %2286 = vmatprep.subr.mxu1 %v3035_v3  ;;  %2255 = vmatprep.subr.mxu0 %v3051_v7 }
 0x256   : > { %2287 = vmatpush3.msra.mxu1 %v3039_v4  ;;  %2256 = vmatpush3.msra.mxu0 %v3055_v8 }
 0x257   : > { %2288 = vmatprep.subr.mxu1 %v3043_v5  ;;  %1800 = vmatprep.mubr.f32.mxu1 %v1324_v34 }
 0x258   : > { %2257 = vmatprep.subr.mxu0 %v3059_v9  ;;  %2289 = vmatpush3.msra.mxu1 %v3047_v6 }
 0x259   : > { %2258 = vmatpush3.msra.mxu0 %v3063_v10  ;;  %2290 = vmatprep.subr.mxu1 %v3051_v7  ;;  %v3309_v37 = vpop.permute.xlu1 %2474  ;;  %v3336_v45 = vpop.permute.xlu0 %1279 }
 0x25a   : > { %2259 = vmatprep.subr.mxu0 %v3067_v11  ;;  %2291 = vmatpush3.msra.mxu1 %v3055_v8  ;;  %v2477_v44 = vunpack.i.h.bf16 %v3309_v37  ;;  %v2476_v21 = vunpack.i.l.bf16 %v3309_v37  ;;  %v1312_v32 = vsel %vm319_vm1, %v3336_v45, 0.0 }
 0x25b   : > { %2260 = vmatpush3.msra.mxu0 %v3071_v12  ;;  %2292 = vmatprep.subr.mxu1 %v3059_v9  ;;  %v1328_v48 = vmax.f32 %v3154_v43, %v1312_v32 }
 0x25c   : > { %2261 = vmatprep.subr.mxu0 %v3075_v13  ;;  %2293 = vmatpush3.msra.mxu1 %v3063_v10  ;;  %v1294_v23 = vsel %vm319_vm1, %v2476_v21, %v2477_v44 }
 0x25d   : > { %2262 = vmatpush3.msra.mxu0 %v3079_v14  ;;  %2294 = vmatprep.subr.mxu1 %v3067_v11  ;;  %v1326_v0 = vmax.f32 %v3148_v40, %v1294_v23 }
 0x25e   : > { %2263 = vmatprep.subr.mxu0 %v3088_v15  ;;  %2295 = vmatpush3.msra.mxu1 %v3071_v12 }
 0x25f   : > { %2264 = vmatpush3.msra.mxu0 %v3091_v16  ;;  %2296 = vmatprep.subr.mxu1 %v3075_v13 }
 0x260   : > { %2265 = vmatprep.subr.mxu0 %v3093_v17  ;;  %2297 = vmatpush3.msra.mxu1 %v3079_v14 }
 0x261   : > { %2266 = vmatpush3.msra.mxu0 %v3095_v18  ;;  %2298 = vmatprep.subr.mxu1 %v3088_v15 }
 0x262   : > { %2267 = vmatprep.subr.mxu0 %v3103_v19  ;;  %2299 = vmatpush3.msra.mxu1 %v3091_v16 }
 0x263   : > { %2268 = vmatpush3.msra.mxu0 %v3107_v20  ;;  %2300 = vmatprep.subr.mxu1 %v3093_v17 }
 0x264   : > { %1727 = vmatmul.mubr.f32.vlgmr.msra.gmra.mxu0 %v1321_v25  ;;  %2301 = vmatpush3.msra.mxu1 %v3095_v18 }
 0x265   : > { %2307 = vmatprep.subr.mxu0 %v2984_v52  ;;  %2302 = vmatprep.subr.mxu1 %v3103_v19 }
 0x266   : > { %2308 = vmatpush3.msra.mxu0 %v2986_v54  ;;  %1874 = vmatprep.mubr.f32.mxu0 %v1326_v0 }
 0x267   : > { %2303 = vmatpush3.msra.mxu1 %v3107_v20  ;;  %2309 = vmatprep.subr.mxu0 %v2988_v55 }
 0x268   : > { %1801 = vmatmul.mubr.f32.vlgmr.msra.gmra.mxu1 %v1323_v47  ;;  %2310 = vmatpush3.msra.mxu0 %v2991_v56 }
 0x269   : > { %2342 = vmatprep.subr.mxu1 %v2984_v52  ;;  %2311 = vmatprep.subr.mxu0 %v2995_v57  ;;  %v1293_v52 = vsel %vm319_vm1, %v2472_v33, %v2476_v21 }
 0x26a   : > { %2343 = vmatpush3.msra.mxu1 %v2986_v54  ;;  %1948 = vmatprep.mubr.f32.mxu1 %v1328_v48  ;;  %v1295_v54 = vsel %vm319_vm1, %v2477_v44, %v3336_v45 }
 0x26b   : > { %2312 = vmatpush3.msra.mxu0 %v2999_v53  ;;  %2344 = vmatprep.subr.mxu1 %v2988_v55  ;;  %v1325_v55 = vmax.f32 %v3143_v38, %v1293_v52 }
 0x26c   : > { %2313 = vmatprep.subr.mxu0 %v3003_v58  ;;  %2345 = vmatpush3.msra.mxu1 %v2991_v56  ;;  %v1327_v56 = vmax.f32 %v3150_v41, %v1295_v54 }
 0x26d   : > { %2314 = vmatpush3.msra.mxu0 %v3007_v59  ;;  %2346 = vmatprep.subr.mxu1 %v2995_v57 }
 0x26e   : > { %2315 = vmatprep.subr.mxu0 %v3011_v60  ;;  %2347 = vmatpush3.msra.mxu1 %v2999_v53 }
 0x26f   : > { %2316 = vmatpush3.msra.mxu0 %v3015_v61  ;;  %2348 = vmatprep.subr.mxu1 %v3003_v58  ;;  %v1365_v58 = vpop.permute.xlu1 %1364 }
 0x270   : > { %2317 = vmatprep.subr.mxu0 %v3019_v62  ;;  %2349 = vmatpush3.msra.mxu1 %v3007_v59 }
 0x271   : > { %2318 = vmatpush3.msra.mxu0 %v3023_v63  ;;  %2350 = vmatprep.subr.mxu1 %v3011_v60 }
 0x272   : > { %2319 = vmatprep.subr.mxu0 %v3027_v1  ;;  %2351 = vmatpush3.msra.mxu1 %v3015_v61 }
 0x273   : > { %2320 = vmatpush3.msra.mxu0 %v3031_v2  ;;  %2352 = vmatprep.subr.mxu1 %v3019_v62 }
 0x274   : > { %2321 = vmatprep.subr.mxu0 %v3035_v3  ;;  %2353 = vmatpush3.msra.mxu1 %v3023_v63 }
 0x275   : > { %2322 = vmatpush3.msra.mxu0 %v3039_v4  ;;  %2354 = vmatprep.subr.mxu1 %v3027_v1 }
 0x276   : > { %2323 = vmatprep.subr.mxu0 %v3043_v5  ;;  %2355 = vmatpush3.msra.mxu1 %v3031_v2 }
 0x277   : > { %2324 = vmatpush3.msra.mxu0 %v3047_v6  ;;  %2356 = vmatprep.subr.mxu1 %v3035_v3 }
 0x278   : > { %2325 = vmatprep.subr.mxu0 %v3051_v7  ;;  %2357 = vmatpush3.msra.mxu1 %v3039_v4 }
 0x279   : > { %2326 = vmatpush3.msra.mxu0 %v3055_v8  ;;  %2358 = vmatprep.subr.mxu1 %v3043_v5 }
 0x27a   : > { %2327 = vmatprep.subr.mxu0 %v3059_v9  ;;  %2359 = vmatpush3.msra.mxu1 %v3047_v6 }
 0x27b   : > { %2328 = vmatpush3.msra.mxu0 %v3063_v10  ;;  %2360 = vmatprep.subr.mxu1 %v3051_v7 }
 0x27c   : > { %2329 = vmatprep.subr.mxu0 %v3067_v11  ;;  %2361 = vmatpush3.msra.mxu1 %v3055_v8 }
 0x27d   : > { %2330 = vmatpush3.msra.mxu0 %v3071_v12  ;;  %2362 = vmatprep.subr.mxu1 %v3059_v9 }
 0x27e   : > { %2331 = vmatprep.subr.mxu0 %v3075_v13  ;;  %2363 = vmatpush3.msra.mxu1 %v3063_v10 }
 0x27f   : > { %2332 = vmatpush3.msra.mxu0 %v3079_v14  ;;  %2364 = vmatprep.subr.mxu1 %v3067_v11 }
 0x280   : > { %2333 = vmatprep.subr.mxu0 %v3088_v15  ;;  %2365 = vmatpush3.msra.mxu1 %v3071_v12 }
 0x281   : > { %2334 = vmatpush3.msra.mxu0 %v3091_v16  ;;  %2366 = vmatprep.subr.mxu1 %v3075_v13 }
 0x282   : > { %2335 = vmatprep.subr.mxu0 %v3093_v17  ;;  %2367 = vmatpush3.msra.mxu1 %v3079_v14 }
 0x283   : > { %2336 = vmatpush3.msra.mxu0 %v3095_v18  ;;  %2368 = vmatprep.subr.mxu1 %v3088_v15 }
 0x284   : > { %2337 = vmatprep.subr.mxu0 %v3103_v19  ;;  %2369 = vmatpush3.msra.mxu1 %v3091_v16 }
 0x285   : > { %2338 = vmatpush3.msra.mxu0 %v3107_v20  ;;  %2370 = vmatprep.subr.mxu1 %v3093_v17 }
 0x286   : > { %1875 = vmatmul.mubr.f32.vlgmr.msra.gmra.mxu0 %v1325_v55  ;;  %2371 = vmatpush3.msra.mxu1 %v3095_v18 }
 0x287   : > { %2372 = vmatprep.subr.mxu1 %v3103_v19 }
 0x288   : > { %2373 = vmatpush3.msra.mxu1 %v3107_v20 }
 0x289   : > { %1949 = vmatmul.mubr.f32.vlgmr.msra.gmra.mxu1 %v1327_v56 }
 0x2e1   : > { %v2129_v57 = vpop.f32.mrf.mxu0 }
 0x2e3   : > { %v2130_v53 = vpop.f32.mrf.mxu0 }
 0x2e4   : > { %v2131_v59 = vadd.f32 %v2130_v53, %v2129_v57  ;;  %v2164_v60 = vpop.f32.mrf.mxu1 }
 0x2e6   : > { %v1434_v61 = vadd.f32 %v2131_v59, %v1365_v58  ;;  %v2165_v62 = vpop.f32.mrf.mxu1 }
 0x2e7   : > { %v2166_v63 = vadd.f32 %v2165_v62, %v2164_v60 }
 0x2e8   : > { %v1437_v1 = vmul.f32 0.2, %v1434_v61 }
 0x2e9   : > { %v1507_v2 = vadd.f32 %v2166_v63, %v1365_v58 }
 0x2ea   : > { %v1438_v3 = vmax.f32 %v1434_v61, %v1437_v1 }
 0x2eb   : > { %v1510_v4 = vmul.f32 0.2, %v1507_v2 }
 0x2ec   : > { %1439 = vst [vmem:[%s3430_s13] sm:$0xff] %v1438_v3 }
 0x2ed   : > { %v1511_v5 = vmax.f32 %v1507_v2, %v1510_v4 }
 0x2ef   : > { %2082 = vst [vmem:[%s3430_s13 + $0x8] sm:$0xff] %v1511_v5 }
 0x302   : > { %v2199_v6 = vpop.f32.mrf.mxu0 }
 0x304   : > { %v2200_v7 = vpop.f32.mrf.mxu0 }
 0x305   : > { %v2201_v8 = vadd.f32 %v2200_v7, %v2199_v6  ;;  %v2234_v9 = vpop.f32.mrf.mxu1 }
 0x307   : > { %v1581_v10 = vadd.f32 %v2201_v8, %v1365_v58  ;;  %v2235_v11 = vpop.f32.mrf.mxu1 }
 0x308   : > { %v2236_v12 = vadd.f32 %v2235_v11, %v2234_v9 }
 0x309   : > { %v1584_v13 = vmul.f32 0.2, %v1581_v10 }
 0x30a   : > { %v1655_v14 = vadd.f32 %v2236_v12, %v1365_v58 }
 0x30b   : > { %v1585_v15 = vmax.f32 %v1581_v10, %v1584_v13 }
 0x30c   : > { %v1658_v16 = vmul.f32 0.2, %v1655_v14 }
 0x30d   : > { %2083 = vst [vmem:[%s3430_s13 + $0x10] sm:$0xff] %v1585_v15 }
 0x30e   : > { %v1659_v17 = vmax.f32 %v1655_v14, %v1658_v16 }
 0x310   : > { %2084 = vst [vmem:[%s3430_s13 + $0x18] sm:$0xff] %v1659_v17 }
 0x324   : > { %v2269_v18 = vpop.f32.mrf.mxu0 }
 0x326   : > { %v2270_v19 = vpop.f32.mrf.mxu0 }
 0x327   : > { %v2271_v20 = vadd.f32 %v2270_v19, %v2269_v18 }
 0x328   : > { %v2304_v35 = vpop.f32.mrf.mxu1 }
 0x329   : > { %v1729_v38 = vadd.f32 %v2271_v20, %v1365_v58 }
 0x32a   : > { %v2305_v40 = vpop.f32.mrf.mxu1 }
 0x32b   : > { %v1732_v41 = vmul.f32 0.2, %v1729_v38  ;;  %v2306_v43 = vadd.f32 %v2305_v40, %v2304_v35 }
 0x32d   : > { %v1733_v28 = vmax.f32 %v1729_v38, %v1732_v41  ;;  %v1803_v49 = vadd.f32 %v2306_v43, %v1365_v58 }
 0x32f   : > { %2085 = vst [vmem:[%s3430_s13 + $0x20] sm:$0xff] %v1733_v28  ;;  %v1806_v31 = vmul.f32 0.2, %v1803_v49 }
 0x331   : > { %v1807_v51 = vmax.f32 %v1803_v49, %v1806_v31 }
 0x333   : > { %2086 = vst [vmem:[%s3430_s13 + $0x28] sm:$0xff] %v1807_v51 }
 0x346   : > { %v2339_v50 = vpop.f32.mrf.mxu0 }
 0x348   : > { %v2340_v26 = vpop.f32.mrf.mxu0 }
 0x349   : > { %v2341_v29 = vadd.f32 %v2340_v26, %v2339_v50  ;;  %v2374_v24 = vpop.f32.mrf.mxu1 }
 0x34b   : > { %v1877_v27 = vadd.f32 %v2341_v29, %v1365_v58  ;;  %v2375_v30 = vpop.f32.mrf.mxu1 }
 0x34c   : > { %v2376_v33 = vadd.f32 %v2375_v30, %v2374_v24 }
 0x34d   : > { %v1880_v36 = vmul.f32 0.2, %v1877_v27 }
 0x34e   : > { %v1951_v39 = vadd.f32 %v2376_v33, %v1365_v58 }
 0x34f   : > { %v1881_v42 = vmax.f32 %v1877_v27, %v1880_v36 }
 0x350   : > { %v1954_v34 = vmul.f32 0.2, %v1951_v39 }
 0x351   : > { %2087 = vst [vmem:[%s3430_s13 + $0x30] sm:$0xff] %v1881_v42 }
 0x352   : > { %v1955_v37 = vmax.f32 %v1951_v39, %v1954_v34 }
 0x354   : > { %2088 = vst [vmem:[%s3430_s13 + $0x38] sm:$0xff] %v1955_v37 }
 0x355   : > { %2555 = shalt.err (!%p2552_p0)
}
 0x356   : > { %s2556_s23 = scalar_lea.hbm %s3444_s7, 1024  ;;  %s2560_s24 = scalar_lea.hbm %s3494_s4, 2048 }
 0x357   : > { %p2557_p5 = scmp.ne.s32.totalorder %s3444_s7, %s2556_s23  ;;  %p2561_p4 = scmp.lt.s32.totalorder %s3444_s7, %s3494_s4 }
 0x358   : > { %p2562_p6 = scmp.lt.s32.totalorder %s2560_s24, %s2556_s23 }
 0x359   : > { %p2558_p2 = pnand %p2557_p5, %p3510_p11 }
 0x35a   : > { %p2563_p8 = por %p2562_p6, %p2561_p4 }
 0x35b   : > { %p2559_p1 = pneg %p2558_p2 }
 0x35d   : > { %p2564_p3 = pnand %p2563_p8, %p2559_p1 }
 0x35f   : > { %2567 = shalt.err (!%p2564_p3)
}
 0x360   : > { %s2622_s13 = smov 128   ;;  %s2623_s14 = smov 8  }
 0x361   : > { %2383 = dma.vmem_to_hbm [thread:$0]  (%p3510_p11), %s3446_s11, 1024, %s3444_s7, %s1959_s8, %s2622_s13, %s2622_s13, %s2623_s14  }
 0x362 PF: > { %s1987_s20 = sand.u32 1, %s2598_s15   ;;  %p3511_p7 = scmp.ne.s32.totalorder %s3500_s22, 0 }
 0x363   : > { %p3512_p9 = scmp.ge.s32.totalorder %s2610_s18, 2  ;;  %s1988_s25 = scalar_lea.sflag [#allocation5], %s1987_s20 }
 0x365   : > { %p2394_p10 = pnand %p3512_p9, %p3511_p7 }
 0x367   : > { %p2395_p12 = pneg %p2394_p10 }
 0x369   : > { %2593 = dma.done.wait (%p2395_p12), %s1988_s25, 1024  }
 0x36a   : > { %2595 = vsyncadd (%p2395_p12), %s1988_s25, 4294966272  ;;  %p18_p13 = scmp.ge.s32.totalorder %s2703_s27, 4   ;;  %s3513_s15 = smov %s2602_s16 }
 0x36b   : > { %s3514_s16 = smov %s2606_s17  ;;  %s3515_s17 = smov %s2723_s9 }
 0x36c   : > { %s3516_s18 = smov %s2703_s27  ;;  %20 = sbr.rel (!%p18_p13) target bundleno = 6 (0x6), region = 99 }
 0x371   :  { %1993 = vsyncpa [#allocation4], 1 }
 0x372   :  { %1995 = vsyncpa [#allocation4 + $0x1], 1 }
 0x373   :  { %1996 = vsyncpa [#allocation7], 1 }
 0x374   :  { %1997 = vsyncpa [#allocation5], 1 }
 0x375   :  { %1999 = vsyncpa [#allocation5 + $0x1], 1 }

</bundles_post_ra>
